<compile_context>
chip_gen: v6e
topology: v6e:2x2x1
jax: 0.10.0
libtpu: 0.0.40
codegen_flags: <defaults>
</compile_context>

<pallas_src>
import functools

import jax
import jax.numpy as jnp
from jax import lax
from jax.experimental import pallas as pl
from jax.experimental.pallas import tpu as pltpu


def _round_up(x, m):
    return ((x + m - 1) // m) * m


def _cdiv(a, b):
    return (a + b - 1) // b


def _vmem_capacity_bytes():
    """Per-core VMEM capacity; conservative v7x fallback if the query fails."""
    try:
        return int(pltpu.get_tpu_info().vmem_capacity_bytes)
    except Exception:
        return 64 * 1024 * 1024


def _vmem_bytes_estimate(blk_b, n, m, d, k, in_bytes):
    """Rough per-grid-step VMEM footprint (double-buffered I/O + intermediates)."""
    f32 = 4
    io = 2 * blk_b * (n + m) * d * in_bytes + 2 * blk_b * 2 * d * f32
    weights = 2 * (d * (d + k) + k * d + 2 * k) * f32
    inter = blk_b * (
        m * (d + k) * f32                  # fused C projection (CWl | C@Wc^T)
        + n * k * f32                      # S @ Ws^T
        + m * n * (f32 + in_bytes)         # F (+ hoisted bf16 copy on bf16 path)
        + (n + m) * k * f32                # H_s^T, H_c^T
        + (n + m) * 4 * f32                # logits / softmax temporaries
        + 2 * d * f32)                     # attended summaries
    return io + weights + inter


def _choose_block_b(b, n, m, d, k, budget_bytes, in_bytes, min_blocks):
    """Pick a batch block (multiple of 8) that fits the VMEM budget, keeps
    padding near-minimal, gives >= min_blocks grid steps, and mildly prefers
    fewer grid steps (~0.35us/step overhead)."""
    b8 = _round_up(b, 8)
    best = None
    for blk in range(8, min(b8, 4096) + 1, 8):
        steps = _cdiv(b, blk)
        if steps < min_blocks:
            continue
        if blk > 8 and _vmem_bytes_estimate(blk, n, m, d, k, in_bytes) > budget_bytes:
            continue
        b_pad = blk * steps
        cost = b_pad + 4 * steps           # padding waste + per-step overhead
        key = (cost, -blk)
        if best is None or key < best[0]:
            best = (key, blk, b_pad)
    if best is None:                       # min_blocks unachievable: single 8-row blocks
        return 8, 8 * _cdiv(b, 8)
    return best[1], best[2]


def _co_attention2_kernel(s_ref, c_ref, wlc_ref, ws_ref, hs_ref, hc_ref, out_ref,
                          *, blk_b, n, m, d, k, n_real, m_real, use_bf16_matmul):
    """One batch block per grid step; whole (seq, hidden) tiles live in VMEM."""
    f32 = jnp.float32
    mx_dtype = jnp.bfloat16 if use_bf16_matmul else f32

    S = s_ref[...]           # (B, N, d)  token rows (PyTorch S^T); mx_dtype
    C = c_ref[...]           # (B, M, d)
    Wlc = wlc_ref[...]       # (d, d + k) == [Wl | Wc^T]
    Ws = ws_ref[...]         # (k, d)
    hs = hs_ref[...]         # (1, k) f32
    hc = hc_ref[...]         # (1, k) f32

    # ---- Batch-independent hidden-dim contractions: flat MXU matmuls -------
    # Layout-free reshapes: wrapper guarantees n, m are sublane multiples.
    S2 = S.reshape(blk_b * n, d)
    C2 = C.reshape(blk_b * m, d)
    # Fused: C @ [Wl | Wc^T] -> one MXU pass, then split.
    CW = jnp.dot(C2, Wlc, preferred_element_type=f32)            # (B*M, d+k)
    CWl = CW[:, :d].reshape(blk_b, m, d)                         # C @ Wl
    CWcT = CW[:, d:].reshape(blk_b, m, k)                        # (Wc @ C^T)^T
    # (Ws @ S^T)^T = S @ Ws^T
    SWsT = lax.dot_general(S2, Ws, (((1,), (1,)), ((), ())),
                           preferred_element_type=f32).reshape(blk_b, n, k)

    # ---- F-dependent products (batched MXU); bf16 casts hoisted, once each --
    CWl_m = CWl.astype(mx_dtype)
    # F = tanh((C @ Wl) @ S^T)                     -> (B, M, N)
    # NOTE(v5e): these three tanh calls share the single EUP slot; the
    # (B, M, N) one dominates transcendentals for realistic M, N.
    Fm = jnp.tanh(lax.dot_general(CWl_m, S, (((2,), (2,)), ((0,), (0,))),
                                  preferred_element_type=f32))
    Fm_m = Fm.astype(mx_dtype)        # reused by both H_s and H_c matmuls
    CWcT_m = CWcT.astype(mx_dtype)
    SWsT_m = SWsT.astype(mx_dtype)
    # H_s^T = tanh(S@Ws^T + F^T @ (C@Wc^T))        -> (B, N, k)
    HsT = jnp.tanh(SWsT + lax.dot_general(Fm_m, CWcT_m,
                                          (((1,), (1,)), ((0,), (0,))),
                                          preferred_element_type=f32))
    # H_c^T = tanh(C@Wc^T + F @ (S@Ws^T))          -> (B, M, k)
    HcT = jnp.tanh(CWcT + lax.dot_general(Fm_m, SWsT_m,
                                          (((2,), (1,)), ((0,), (0,))),
                                          preferred_element_type=f32))

    # ---- Attention logits: broadcast-mul + k-reduce on VPU/XLU (no MXU) ----
    s_logits = jnp.sum(HsT * hs.reshape(1, 1, k), axis=-1)       # (B, N)
    c_logits = jnp.sum(HcT * hc.reshape(1, 1, k), axis=-1)       # (B, M)

    # Mask sublane-padding tokens so the softmax normalization is unchanged.
    if n_real != n:
        tok = lax.broadcasted_iota(jnp.int32, (1, n), 1)
        s_logits = jnp.where(tok < n_real, s_logits, -1e30)
    if m_real != m:
        tok = lax.broadcasted_iota(jnp.int32, (1, m), 1)
        c_logits = jnp.where(tok < m_real, c_logits, -1e30)

    def _softmax(x):
        e = jnp.exp(x - jnp.max(x, axis=-1, keepdims=True))
        # EUP approximate reciprocal: a pure per-row scale.  Attention rows
        # therefore sum to 1 only up to a small hardware-dependent relative
        # error; covered by the rtol in the reference check.
        return e * pl.reciprocal(jnp.sum(e, axis=-1, keepdims=True), approx=True)

    a_s = _softmax(s_logits)                                     # (B, N)
    a_c = _softmax(c_logits)                                     # (B, M)

    # ---- Attended summaries: broadcast-mul + sublane reduce (no MXU) -------
    out_S = jnp.sum(S.astype(f32) * a_s[:, :, None], axis=1)     # (B, d)
    out_C = jnp.sum(C.astype(f32) * a_c[:, :, None], axis=1)     # (B, d)

    # Single lane-contiguous full-block store (no lane-offset partial stores).
    out_ref[...] = jnp.concatenate([out_S, out_C], axis=-1)


def co_attention2(S, C, Wl, Ws, Wc, hs, hc, *,
                  vmem_budget_bytes=None, use_bf16_matmul=False):
    """S: (B, N, d), C: (B, M, d) -> (B, 2*d).  Matches the PyTorch forward."""
    B, N_in, d = S.shape
    _, M_in, _ = C.shape
    k = Ws.shape[0]

    in_dtype = jnp.bfloat16 if use_bf16_matmul else jnp.float32
    in_bytes = 2 if use_bf16_matmul else 4
    tok_align = 16 if use_bf16_matmul else 8   # sublane packing unit

    # Pad token axes so in-kernel reshapes are layout-free; padded tokens are
    # zero rows and get masked to -inf before the softmax inside the kernel.
    N = _round_up(N_in, tok_align)
    M = _round_up(M_in, tok_align)
    if N != N_in:
        S = jnp.pad(S, ((0, 0), (0, N - N_in), (0, 0)))
    if M != M_in:
        C = jnp.pad(C, ((0, 0), (0, M - M_in), (0, 0)))

    # Fused C-projection weight: C @ [Wl | Wc^T] in a single MXU pass.
    Wlc = jnp.concatenate([Wl, Wc.T], axis=1)                    # (d, d + k)

    # bf16 casts happen HBM-side: halves S/C DMA bytes and block VMEM.
    S = S.astype(in_dtype)
    C = C.astype(in_dtype)
    Wlc = Wlc.astype(in_dtype)
    Ws_in = Ws.astype(in_dtype)
    hs = hs.astype(jnp.float32)
    hc = hc.astype(jnp.float32)

    # Generation-aware VMEM sizing.
    vmem_cap = _vmem_capacity_bytes()
    if vmem_budget_bytes is None:
        vmem_budget_bytes = (vmem_cap * 3) // 4   # ~96 MiB v5e/v6e, ~48 MiB v7x

    # >= 2 grid steps when the batch allows it: enables megacore sharding on
    # v7x's two TensorCores and input-DMA/compute overlap on all generations.
    min_blocks = 2 if _round_up(B, 8) >= 16 else 1
    blk_b, b_pad = _choose_block_b(B, N, M, d, k, vmem_budget_bytes, in_bytes,
                                   min_blocks)
    if b_pad != B:
        # Zero batch padding is safe: rows are independent, produce finite
        # all-zero outputs, and are sliced off below.
        S = jnp.pad(S, ((0, b_pad - B), (0, 0), (0, 0)))
        C = jnp.pad(C, ((0, b_pad - B), (0, 0), (0, 0)))

    est = _vmem_bytes_estimate(blk_b, N, M, d, k, in_bytes)
    # Headroom above the estimate, but never more than 7/8 of physical VMEM
    # (leaves Mosaic internal scratch / semaphore space, esp. on v7x's 64 MiB).
    vmem_limit = int(min(max(2 * est, 32 * 1024 * 1024), (vmem_cap * 7) // 8))

    def _weight_spec(shape):
        # Grid-invariant weights (constant index_map -> fetched once).  For
        # large d, drop to a single pipeline buffer to reclaim the second copy.
        if d >= 256:
            return pl.BlockSpec(shape, lambda b: (0, 0),
                                pipeline_mode=pl.Buffered(1))
        return pl.BlockSpec(shape, lambda b: (0, 0))

    kernel = functools.partial(
        _co_attention2_kernel, blk_b=blk_b, n=N, m=M, d=d, k=k,
        n_real=N_in, m_real=M_in, use_bf16_matmul=use_bf16_matmul)

    out = pl.pallas_call(
        kernel,
        out_shape=jax.ShapeDtypeStruct((b_pad, 2 * d), jnp.float32),
        grid_spec=pltpu.PrefetchScalarGridSpec(
            num_scalar_prefetch=0,
            grid=(b_pad // blk_b,),
            in_specs=[
                pl.BlockSpec((blk_b, N, d), lambda b: (b, 0, 0)),   # S
                pl.BlockSpec((blk_b, M, d), lambda b: (b, 0, 0)),   # C
                _weight_spec((d, d + k)),                           # [Wl | Wc^T]
                _weight_spec((k, d)),                               # Ws
                _weight_spec((1, k)),                               # hs
                _weight_spec((1, k)),                               # hc
            ],
            out_specs=pl.BlockSpec((blk_b, 2 * d), lambda b: (b, 0)),
        ),
        compiler_params=pltpu.CompilerParams(
            dimension_semantics=("parallel",),   # megacore-shardable on v7x
            vmem_limit_bytes=vmem_limit),
    )(S, C, Wlc, Ws_in, hs, hc)

    return out[:B] if b_pad != B else out


def co_attention2_ref(S, C, Wl, Ws, Wc, hs, hc):
    """Pure-JAX reference mirroring the PyTorch forward exactly."""
    St = jnp.swapaxes(S, 1, 2)            # (B, d, N)
    Ct = jnp.swapaxes(C, 1, 2)            # (B, d, M)
    Fm = jnp.tanh(jnp.einsum('bdm,de,ben->bmn', Ct, Wl, St))          # (B, M, N)
    WsS = jnp.einsum('kd,bdn->bkn', Ws, St)                           # (B, k, N)
    WcC = jnp.einsum('kd,bdm->bkm', Wc, Ct)                           # (B, k, M)
    H_s = jnp.tanh(WsS + jnp.einsum('bkm,bmn->bkn', WcC, Fm))
    H_c = jnp.tanh(WcC + jnp.einsum('bkn,bmn->bkm', WsS, Fm))
    a_s = jax.nn.softmax(jnp.einsum('ok,bkn->bon', hs, H_s), axis=2)  # (B,1,N)
    a_c = jax.nn.softmax(jnp.einsum('ok,bkm->bom', hc, H_c), axis=2)  # (B,1,M)
    So = jnp.einsum('bon,bnd->bod', a_s, S).sum(1)                    # (B, d)
    Co = jnp.einsum('bom,bmd->bod', a_c, C).sum(1)                    # (B, d)
    return jnp.concatenate([So, Co], axis=1)


if __name__ == "__main__":
    # Small deterministic shapes: batch=2, seq_S=8, seq_C=8,
    # hidden_size_att=32, hidden_size_co=16.
    B, N, M, d_att, k_co = 2, 8, 8, 32, 16

    key = jax.random.PRNGKey(0)
    ks, kc, k1, k2, k3, k4, k5 = jax.random.split(key, 7)

    S = jax.random.normal(ks, (B, N, d_att), dtype=jnp.float32)
    C = jax.random.normal(kc, (B, M, d_att), dtype=jnp.float32)

    # torch.rand -> uniform [0, 1)
    Wl = jax.random.uniform(k1, (d_att, d_att), dtype=jnp.float32)
    Ws = jax.random.uniform(k2, (k_co, d_att), dtype=jnp.float32)
    Wc = jax.random.uniform(k3, (k_co, d_att), dtype=jnp.float32)
    hs = jax.random.uniform(k4, (1, k_co), dtype=jnp.float32)
    hc = jax.random.uniform(k5, (1, k_co), dtype=jnp.float32)

    # f32 path vs. reference (approx-reciprocal softmax covered by rtol).
    out = jax.block_until_ready(co_attention2(S, C, Wl, Ws, Wc, hs, hc))
    ref = co_attention2_ref(S, C, Wl, Ws, Wc, hs, hc)
    assert out.shape == (B, 2 * d_att)
    assert jnp.allclose(out, ref, atol=1e-3, rtol=1e-2), (out, ref)

    # Non-multiple-of-8 token count: exercises the wrapper pad + in-kernel
    # -inf logit mask path (must still match the reference exactly).
    S7 = S[:, :7, :]
    out7 = jax.block_until_ready(co_attention2(S7, C, Wl, Ws, Wc, hs, hc))
    ref7 = co_attention2_ref(S7, C, Wl, Ws, Wc, hs, hc)
    assert out7.shape == (B, 2 * d_att)
    assert jnp.allclose(out7, ref7, atol=1e-3, rtol=1e-2), (out7, ref7)

    # bf16 MXU-input path (HBM-side casts, f32 accumulation): loose-tolerance
    # numeric check against the f32 reference, as bf16 inputs change numerics.
    out_bf16 = jax.block_until_ready(
        co_attention2(S, C, Wl, Ws, Wc, hs, hc, use_bf16_matmul=True))
    assert out_bf16.shape == (B, 2 * d_att)
    assert bool(jnp.all(jnp.isfinite(out_bf16)))
    assert jnp.allclose(out_bf16, ref, atol=2e-1, rtol=2e-1), (out_bf16, ref)

    print("KERNEL_OK")
</pallas_src>

<mosaic_0001>
module attributes {stable_mosaic.version = 11 : i64} {
  func.func @_co_attention2_kernel(%arg0: i32, %arg1: memref<8x8x32xf32, #tpu.memory_space<vmem>>, %arg2: memref<8x8x32xf32, #tpu.memory_space<vmem>>, %arg3: memref<32x48xf32, #tpu.memory_space<vmem>>, %arg4: memref<16x32xf32, #tpu.memory_space<vmem>>, %arg5: memref<1x16xf32, #tpu.memory_space<vmem>>, %arg6: memref<1x16xf32, #tpu.memory_space<vmem>>, %arg7: memref<8x64xf32, #tpu.memory_space<vmem>>) attributes {dimension_semantics = [#tpu.dimension_semantics<parallel>], iteration_bounds = array<i64: 1>, scalar_prefetch = 0 : i64, scratch_operands = 0 : i64, tpu.core_type = #tpu.core_type<tc>, window_params = [{transform_indices = @transform_0, window_bounds = array<i64: 8, 8, 32>}, {transform_indices = @transform_1, window_bounds = array<i64: 8, 8, 32>}, {pipeline_mode = #tpu.pipeline_mode<synchronous>, transform_indices = @transform_2, window_bounds = array<i64: 32, 48>}, {pipeline_mode = #tpu.pipeline_mode<synchronous>, transform_indices = @transform_3, window_bounds = array<i64: 16, 32>}, {pipeline_mode = #tpu.pipeline_mode<synchronous>, transform_indices = @transform_4, window_bounds = array<i64: 1, 16>}, {pipeline_mode = #tpu.pipeline_mode<synchronous>, transform_indices = @transform_5, window_bounds = array<i64: 1, 16>}, {transform_indices = @transform_6, window_bounds = array<i64: 8, 64>}]} {
    %c0 = arith.constant 0 : index
    %c0_0 = arith.constant 0 : index
    %c0_1 = arith.constant 0 : index
    %0 = vector.load %arg1[%c0, %c0_0, %c0_1] : memref<8x8x32xf32, #tpu.memory_space<vmem>>, vector<8x8x32xf32>
    %c0_2 = arith.constant 0 : index
    %c0_3 = arith.constant 0 : index
    %c0_4 = arith.constant 0 : index
    %1 = vector.load %arg2[%c0_2, %c0_3, %c0_4] : memref<8x8x32xf32, #tpu.memory_space<vmem>>, vector<8x8x32xf32>
    %c0_5 = arith.constant 0 : index
    %c0_6 = arith.constant 0 : index
    %2 = vector.load %arg3[%c0_5, %c0_6] : memref<32x48xf32, #tpu.memory_space<vmem>>, vector<32x48xf32>
    %c0_7 = arith.constant 0 : index
    %c0_8 = arith.constant 0 : index
    %3 = vector.load %arg4[%c0_7, %c0_8] : memref<16x32xf32, #tpu.memory_space<vmem>>, vector<16x32xf32>
    %c0_9 = arith.constant 0 : index
    %c0_10 = arith.constant 0 : index
    %4 = vector.load %arg5[%c0_9, %c0_10] : memref<1x16xf32, #tpu.memory_space<vmem>>, vector<1x16xf32>
    %c0_11 = arith.constant 0 : index
    %c0_12 = arith.constant 0 : index
    %5 = vector.load %arg6[%c0_11, %c0_12] : memref<1x16xf32, #tpu.memory_space<vmem>>, vector<1x16xf32>
    %6 = vector.shape_cast %0 : vector<8x8x32xf32> to vector<64x32xf32>
    %7 = vector.shape_cast %1 : vector<8x8x32xf32> to vector<64x32xf32>
    %cst = arith.constant dense<0.000000e+00> : vector<64x48xf32>
    %8 = tpu.matmul %7, %2, %cst {dimension_numbers = #tpu.dot_dimension_numbers<[1], [0], [0], [1], [0, 0, 1, 1], [], []>} : vector<64x32xf32>, vector<32x48xf32>, vector<64x48xf32> -> vector<64x48xf32>
    %9 = vector.extract_strided_slice %8 {offsets = [0, 0], sizes = [64, 32], strides = [1, 1]} : vector<64x48xf32> to vector<64x32xf32>
    %10 = vector.shape_cast %9 : vector<64x32xf32> to vector<8x8x32xf32>
    %11 = vector.extract_strided_slice %8 {offsets = [0, 32], sizes = [64, 16], strides = [1, 1]} : vector<64x48xf32> to vector<64x16xf32>
    %12 = vector.shape_cast %11 : vector<64x16xf32> to vector<8x8x16xf32>
    %cst_13 = arith.constant dense<0.000000e+00> : vector<64x16xf32>
    %13 = tpu.matmul %6, %3, %cst_13 {dimension_numbers = #tpu.dot_dimension_numbers<[1], [1], [0], [0], [0, 0, 1, 0], [], []>} : vector<64x32xf32>, vector<16x32xf32>, vector<64x16xf32> -> vector<64x16xf32>
    %14 = vector.shape_cast %13 : vector<64x16xf32> to vector<8x8x16xf32>
    %cst_14 = arith.constant dense<0.000000e+00> : vector<8x8x8xf32>
    %15 = tpu.matmul %10, %0, %cst_14 {dimension_numbers = #tpu.dot_dimension_numbers<[2], [2], [1], [1], [0, 0, 0, 1, 1, 1], [0], [0]>} : vector<8x8x32xf32>, vector<8x8x32xf32>, vector<8x8x8xf32> -> vector<8x8x8xf32>
    %16 = math.tanh %15 : vector<8x8x8xf32>
    %cst_15 = arith.constant dense<0.000000e+00> : vector<8x8x16xf32>
    %17 = tpu.matmul %16, %12, %cst_15 {dimension_numbers = #tpu.dot_dimension_numbers<[1], [1], [2], [2], [0, 0, 0, 2, 1, 2], [0], [0]>} : vector<8x8x8xf32>, vector<8x8x16xf32>, vector<8x8x16xf32> -> vector<8x8x16xf32>
    %18 = arith.addf %14, %17 : vector<8x8x16xf32>
    %19 = math.tanh %18 : vector<8x8x16xf32>
    %cst_16 = arith.constant dense<0.000000e+00> : vector<8x8x16xf32>
    %20 = tpu.matmul %16, %14, %cst_16 {dimension_numbers = #tpu.dot_dimension_numbers<[2], [1], [1], [2], [0, 0, 0, 1, 1, 2], [0], [0]>} : vector<8x8x8xf32>, vector<8x8x16xf32>, vector<8x8x16xf32> -> vector<8x8x16xf32>
    %21 = arith.addf %12, %20 : vector<8x8x16xf32>
    %22 = math.tanh %21 : vector<8x8x16xf32>
    %23 = vector.shape_cast %4 : vector<1x16xf32> to vector<1x1x16xf32>
    %24 = vector.broadcast %23 : vector<1x1x16xf32> to vector<8x8x16xf32>
    %25 = arith.mulf %19, %24 : vector<8x8x16xf32>
    %cst_17 = arith.constant dense<0.000000e+00> : vector<8x8xf32>
    %26 = vector.multi_reduction <add>, %25, %cst_17 [2] : vector<8x8x16xf32> to vector<8x8xf32>
    %27 = vector.shape_cast %5 : vector<1x16xf32> to vector<1x1x16xf32>
    %28 = vector.broadcast %27 : vector<1x1x16xf32> to vector<8x8x16xf32>
    %29 = arith.mulf %22, %28 : vector<8x8x16xf32>
    %cst_18 = arith.constant dense<0.000000e+00> : vector<8x8xf32>
    %30 = vector.multi_reduction <add>, %29, %cst_18 [2] : vector<8x8x16xf32> to vector<8x8xf32>
    %cst_19 = arith.constant dense<0xFF800000> : vector<8xf32>
    %31 = vector.multi_reduction <maximumf>, %26, %cst_19 [1] : vector<8x8xf32> to vector<8xf32>
    %32 = vector.shape_cast %31 : vector<8xf32> to vector<8x1xf32>
    %33 = vector.broadcast %32 : vector<8x1xf32> to vector<8x8xf32>
    %34 = arith.subf %26, %33 : vector<8x8xf32>
    %35 = math.exp %34 : vector<8x8xf32>
    %cst_20 = arith.constant dense<0.000000e+00> : vector<8xf32>
    %36 = vector.multi_reduction <add>, %35, %cst_20 [1] : vector<8x8xf32> to vector<8xf32>
    %37 = vector.shape_cast %36 : vector<8xf32> to vector<8x1xf32>
    %38 = tpu.reciprocal %37 {approx = true} : vector<8x1xf32> -> vector<8x1xf32>
    %39 = vector.broadcast %38 : vector<8x1xf32> to vector<8x8xf32>
    %40 = arith.mulf %35, %39 : vector<8x8xf32>
    %cst_21 = arith.constant dense<0xFF800000> : vector<8xf32>
    %41 = vector.multi_reduction <maximumf>, %30, %cst_21 [1] : vector<8x8xf32> to vector<8xf32>
    %42 = vector.shape_cast %41 : vector<8xf32> to vector<8x1xf32>
    %43 = vector.broadcast %42 : vector<8x1xf32> to vector<8x8xf32>
    %44 = arith.subf %30, %43 : vector<8x8xf32>
    %45 = math.exp %44 : vector<8x8xf32>
    %cst_22 = arith.constant dense<0.000000e+00> : vector<8xf32>
    %46 = vector.multi_reduction <add>, %45, %cst_22 [1] : vector<8x8xf32> to vector<8xf32>
    %47 = vector.shape_cast %46 : vector<8xf32> to vector<8x1xf32>
    %48 = tpu.reciprocal %47 {approx = true} : vector<8x1xf32> -> vector<8x1xf32>
    %49 = vector.broadcast %48 : vector<8x1xf32> to vector<8x8xf32>
    %50 = arith.mulf %45, %49 : vector<8x8xf32>
    %51 = vector.shape_cast %40 : vector<8x8xf32> to vector<8x8x1xf32>
    %52 = vector.broadcast %51 : vector<8x8x1xf32> to vector<8x8x32xf32>
    %53 = arith.mulf %0, %52 : vector<8x8x32xf32>
    %cst_23 = arith.constant dense<0.000000e+00> : vector<8x32xf32>
    %54 = vector.multi_reduction <add>, %53, %cst_23 [1] : vector<8x8x32xf32> to vector<8x32xf32>
    %55 = vector.shape_cast %50 : vector<8x8xf32> to vector<8x8x1xf32>
    %56 = vector.broadcast %55 : vector<8x8x1xf32> to vector<8x8x32xf32>
    %57 = arith.mulf %1, %56 : vector<8x8x32xf32>
    %cst_24 = arith.constant dense<0.000000e+00> : vector<8x32xf32>
    %58 = vector.multi_reduction <add>, %57, %cst_24 [1] : vector<8x8x32xf32> to vector<8x32xf32>
    %59 = tpu.concatenate %54, %58 in 1 : vector<8x32xf32>, vector<8x32xf32> -> vector<8x64xf32>
    %c0_25 = arith.constant 0 : index
    %c0_26 = arith.constant 0 : index
    %60 = vector.load %arg7[%c0_25, %c0_26] : memref<8x64xf32, #tpu.memory_space<vmem>>, vector<8x64xf32>
    tpu.vector_store %arg7[%c0_25, %c0_26], %59 {strides = array<i32>} : memref<8x64xf32, #tpu.memory_space<vmem>>, vector<8x64xf32>,
    return
  }
  func.func @transform_0(%arg0: i32) -> (i32, i32, i32) {
    %c0_i32 = arith.constant 0 : i32
    %c0_i32_0 = arith.constant 0 : i32
    %c0_i32_1 = arith.constant 0 : i32
    return %arg0, %c0_i32, %c0_i32_0 : i32, i32, i32
  }
  func.func @transform_1(%arg0: i32) -> (i32, i32, i32) {
    %c0_i32 = arith.constant 0 : i32
    %c0_i32_0 = arith.constant 0 : i32
    %c0_i32_1 = arith.constant 0 : i32
    return %arg0, %c0_i32, %c0_i32_0 : i32, i32, i32
  }
  func.func @transform_2(%arg0: i32) -> (i32, i32) {
    %c0_i32 = arith.constant 0 : i32
    %c0_i32_0 = arith.constant 0 : i32
    %c0_i32_1 = arith.constant 0 : i32
    return %c0_i32, %c0_i32_0 : i32, i32
  }
  func.func @transform_3(%arg0: i32) -> (i32, i32) {
    %c0_i32 = arith.constant 0 : i32
    %c0_i32_0 = arith.constant 0 : i32
    %c0_i32_1 = arith.constant 0 : i32
    return %c0_i32, %c0_i32_0 : i32, i32
  }
  func.func @transform_4(%arg0: i32) -> (i32, i32) {
    %c0_i32 = arith.constant 0 : i32
    %c0_i32_0 = arith.constant 0 : i32
    %c0_i32_1 = arith.constant 0 : i32
    return %c0_i32, %c0_i32_0 : i32, i32
  }
  func.func @transform_5(%arg0: i32) -> (i32, i32) {
    %c0_i32 = arith.constant 0 : i32
    %c0_i32_0 = arith.constant 0 : i32
    %c0_i32_1 = arith.constant 0 : i32
    return %c0_i32, %c0_i32_0 : i32, i32
  }
  func.func @transform_6(%arg0: i32) -> (i32, i32) {
    %c0_i32 = arith.constant 0 : i32
    %c0_i32_0 = arith.constant 0 : i32
    return %arg0, %c0_i32 : i32, i32
  }
}

</mosaic_0001>

<bundles_post_ra>
// kernel: tpu_custom_call.1
= control target key start
LH: loop header
LB: loop body
LE: loop exit
PB: predicated region body
PF: predicated region fallthrough
CT: control target
= control target key end

     0   :  { %11 = vsyncpa [#allocation3], 0  ;;  %s4521_s0 = inlined_call_operand.hbm [shape: f32[8,8,32], index: 0, kind: input, shape index: {}]   ;;  %s4522_s1 = inlined_call_operand.hbm [shape: f32[8,8,32], index: 1, kind: input, shape index: {}]   ;;  %s4523_s2 = inlined_call_operand.hbm [shape: f32[32,48], index: 2, kind: input, shape index: {}]   ;;  %s4524_s3 = inlined_call_operand.hbm [shape: f32[16,32], index: 3, kind: input, shape index: {}]   ;;  %s4525_s4 = inlined_call_operand.vmem [shape: f32[1,16], index: 4, kind: input, shape index: {}]   ;;  %s4526_s5 = inlined_call_operand.vmem [shape: f32[1,16], index: 5, kind: input, shape index: {}]   ;;  %s4527_s6 = inlined_call_operand.hbm [shape: f32[8,64], index: 6, kind: output, shape index: {}]  }
   0x1   :  { %12 = vsyncpa [#allocation6], 0 }
   0x2   :  { %13 = vsyncpa [#allocation9], 0 }
   0x3   :  { %14 = vsyncpa [#allocation4], 0  ;;  %s3837_s21 = smov [#allocation5]   ;;  %s3838_s23 = smov [#allocation2]  }
   0x4   :  { %s32_s22 = sshll.u32 %s3837_s21, 4  ;;  %s20_s24 = sshll.u32 %s3838_s23, 4  ;;  %s33_s22 = int_to_ptr.vmem [resolvable:$true] %s32_s22  ;;  %s21_s24 = int_to_ptr.vmem [resolvable:$true] %s20_s24 }
   0x5   :  { %s3737_s25 = scalar_lea.vmem %s33_s22, 1024  ;;  %p3742_p1 = scmp.lt.s32.totalorder %s33_s22, %s33_s22 }
   0x6   :  { %p3738_p0 = scmp.ne.s32.totalorder %s33_s22, %s3737_s25  ;;  %p3743_p2 = scmp.lt.s32.totalorder %s3737_s25, %s3737_s25 }
   0x8   :  { %p3744_p3 = por %p3743_p2, %p3742_p1 }
   0xa   :  { %p3745_p4 = pnand %p3744_p3, %p3738_p0 }
   0xc   :  { %3748 = shalt.err (!%p3745_p4)
}
   0xd   :  { %s3839_s26 = smov 128   ;;  %s3840_s27 = smov 8  }
   0xe   :  { %38 = dma.hbm_to_vmem [thread:$0]  %s4522_s1, 1024, %s33_s22, [#allocation6], %s3839_s26, %s3839_s26, %s3840_s27  }
   0xf   :  { %s3757_s30 = scalar_lea.vmem %s21_s24, 1024  ;;  %p3762_p6 = scmp.lt.s32.totalorder %s21_s24, %s21_s24 }
  0x10   :  { %p3758_p5 = scmp.ne.s32.totalorder %s21_s24, %s3757_s30  ;;  %p3763_p7 = scmp.lt.s32.totalorder %s3757_s30, %s3757_s30 }
  0x12   :  { %p3764_p8 = por %p3763_p7, %p3762_p6 }
  0x14   :  { %p3765_p9 = pnand %p3764_p8, %p3758_p5 }
  0x16   :  { %3768 = shalt.err (!%p3765_p9)
}
  0x17   :  { %26 = dma.hbm_to_vmem [thread:$0]  %s4521_s0, 1024, %s21_s24, [#allocation3], %s3839_s26, %s3839_s26, %s3840_s27  }
  0x18   :  { %s3841_s9 = smov [#allocation7]   ;;  %s3842_s11 = smov [#allocation8]  }
  0x19   :  { %s44_s10 = sshll.u32 %s3841_s9, 4  ;;  %s56_s12 = sshll.u32 %s3842_s11, 4  ;;  %s45_s10 = int_to_ptr.vmem [resolvable:$true] %s44_s10  ;;  %s57_s12 = int_to_ptr.vmem [resolvable:$true] %s56_s12 }
  0x1a   :  { %s3777_s1 = scalar_lea.vmem %s45_s10, 512  ;;  %p3782_p11 = scmp.lt.s32.totalorder %s45_s10, %s45_s10 }
  0x1b   :  { %p3778_p10 = scmp.ne.s32.totalorder %s45_s10, %s3777_s1  ;;  %p3783_p12 = scmp.lt.s32.totalorder %s3777_s1, %s3777_s1 }
  0x1d   :  { %p3784_p13 = por %p3783_p12, %p3782_p11 }
  0x1f   :  { %p3785_p0 = pnand %p3784_p13, %p3778_p10 }
  0x21   :  { %3788 = shalt.err (!%p3785_p0)
}
  0x22   :  { %50 = dma.hbm_to_vmem [thread:$0]  %s4523_s2, 512, %s45_s10, [#allocation6], %s3839_s26, %s3839_s26, %s3840_s27  }
  0x23   :  { %s3797_s0 = scalar_lea.vmem %s57_s12, 256  ;;  %p3802_p2 = scmp.lt.s32.totalorder %s57_s12, %s57_s12 }
  0x24   :  { %p3798_p1 = scmp.ne.s32.totalorder %s57_s12, %s3797_s0  ;;  %p3803_p3 = scmp.lt.s32.totalorder %s3797_s0, %s3797_s0 }
  0x26   :  { %p3804_p4 = por %p3803_p3, %p3802_p2 }
  0x28   :  { %p3805_p5 = pnand %p3804_p4, %p3798_p1 }
  0x2a   :  { %3808 = shalt.err (!%p3805_p5)
}
  0x2b   :  { %62 = dma.hbm_to_vmem [thread:$0]  %s4524_s3, 256, %s57_s12, [#allocation9], %s3839_s26, %s3839_s26, %s3840_s27  }
  0x2c   :  { %3829 = dma.done.wait [#allocation3], 1024  }
  0x2d   :  { %3830 = vsyncadd [#allocation3], 4294966272 }
  0x2e   :  { %3831 = dma.done.wait [#allocation6], 1536  }
  0x2f   :  { %3832 = vsyncadd [#allocation6], 4294965760 }
  0x30   :  { %3833 = dma.done.wait [#allocation9], 256  }
  0x31   :  { %3834 = vsyncadd [#allocation9], 4294967040  ;;  %vm103_vm0 = vcmask 261120   ;;  %v98_v0 = vld [vmem:[#allocation7 + $0x18] sm:$0xff]  ;;  %v97_v1 = vld [vmem:[#allocation7 + $0x10] sm:$0xff]  ;;  %v3843_v10 = vmov 0.0  }
  0x32   :  { %3459 = vmatprep.subr.mxu0 %v98_v0  ;;  %v87_v2 = vld [vmem:[#allocation5] sm:$0xff]  ;;  %v96_v3 = vld [vmem:[#allocation7 + $0x8] sm:$0xff]  ;;  %v89_v9 = vld [vmem:[#allocation5 + $0x10] sm:$0xff]  ;;  %vm3844_vm1 = vmmov 0   ;;  %s3845_s2 = smov 96   ;;  %vm995_vm2 = vcmask 64512  }
  0x33   :  { %3460 = vmatpush3.msra.mxu0 %v98_v0  ;;  %3467 = vmatprep.mubr.msk.f32.mxu0 %vm103_vm0, %v87_v2  ;;  %v95_v4 = vld [vmem:[#allocation7] sm:$0xff]  ;;  %v100_v5 = vld [vmem:[#allocation8 + $0x8] sm:$0xff]  ;;  %v90_v11 = vld [vmem:[#allocation5 + $0x18] sm:$0xff]  ;;  %s3846_s3 = smov 32   ;;  %vm2487_vm3 = vcmask 130048   ;;  %vm2626_vm4 = vcmask 1041409  }
  0x34   :  { %3461 = vmatprep.subr.mxu0 %v97_v1  ;;  %v99_v6 = vld [vmem:[#allocation8] sm:$0xff]  ;;  %3479 = vmatprep.subr.msk.mxu1 %vm103_vm0, %v100_v5  ;;  %v88_v8 = vld [vmem:[#allocation5 + $0x8] sm:$0xff]  ;;  %v81_v14 = vld [vmem:[#allocation2 + $0x10] sm:$0xff]  ;;  %vm2628_vm5 = vcmask 1042434   ;;  %vm2630_vm6 = vcmask 1043459   ;;  %vm2632_vm7 = vcmask 1044484  }
  0x35   :  { %3462 = vmatpush3.msra.mxu0 %v97_v1  ;;  %v79_v7 = vld [vmem:[#allocation2] sm:$0xff]  ;;  %3480 = vmatpush3.xpose.msk.msra.mxu1 %vm103_vm0, %v100_v5  ;;  %v80_v12 = vld [vmem:[#allocation2 + $0x8] sm:$0xff]  ;;  %v82_v16 = vld [vmem:[#allocation2 + $0x18] sm:$0xff]  ;;  %vm2634_vm8 = vcmask 1045509   ;;  %vm2636_vm9 = vcmask 1046534   ;;  %vm2638_vm10 = vcmask 1047559  }
  0x36   :  { %3463 = vmatprep.subr.mxu0 %v96_v3  ;;  %3481 = vmatprep.subr.msk.mxu1 %vm103_vm0, %v99_v6  ;;  %v91_v13 = vld [vmem:[#allocation5 + $0x20] sm:$0xff]  ;;  %v92_v15 = vld [vmem:[#allocation5 + $0x28] sm:$0xff]  ;;  %v93_v17 = vld [vmem:[#allocation5 + $0x30] sm:$0xff]  ;;  %vm3318_vm11 = vcmask 523264  }
  0x37   :  { %3464 = vmatpush3.msra.mxu0 %v96_v3  ;;  %3483 = vmatprep.mubr.msk.f32.mxu1 %vm103_vm0, %v79_v7  ;;  %v83_v18 = vld [vmem:[#allocation2 + $0x20] sm:$0xff]  ;;  %v94_v19 = vld [vmem:[#allocation5 + $0x38] sm:$0xff]  ;;  %v84_v20 = vld [vmem:[#allocation2 + $0x28] sm:$0xff] }
  0x38   :  { %3465 = vmatprep.subr.mxu0 %v95_v4  ;;  %v85_v21 = vld [vmem:[#allocation2 + $0x30] sm:$0xff]  ;;  %v86_v22 = vld [vmem:[#allocation2 + $0x38] sm:$0xff] }
  0x39   :  { %3466 = vmatpush3.msra.mxu0 %v95_v4  ;;  %3482 = vmatpush3.xpose.msk.msra.mxu1 %vm103_vm0, %v99_v6 }
  0x3a   :  { %3468 = vmatmul.mubr.msk.f32.vlgmr.msra.gmra.mxu0 %vm103_vm0, %v88_v8  ;;  %3495 = vmatprep.subr.mxu0 %v3843_v10 }
  0x3b   :  { %3470 = vmatprep.mubr.msk.f32.mxu0 %vm103_vm0, %v89_v9  ;;  %3500 = vmatprep.subr.mxu1 %v3843_v10 }
  0x3c   :  { %3496 = vmatpush3.xpose.msk.msra.mxu0 %vm103_vm0, %v79_v7  ;;  %3484 = vmatmul.mubr.msk.f32.vlgmr.msra.gmra.mxu1 %vm103_vm0, %v80_v12 }
  0x3d   :  { %3505 = vmatprep.subr.mxu0 %v3843_v10  ;;  %3501 = vmatpush3.xpose.msk.msra.mxu1 %vm103_vm0, %v80_v12 }
  0x3e   :  { %3471 = vmatmul.mubr.msk.f32.gmra.mxu0 %vm103_vm0, %v90_v11  ;;  %3486 = vmatprep.mubr.msk.f32.mxu1 %vm103_vm0, %v81_v14 }
  0x3f   :  { %3473 = vmatprep.mubr.msk.f32.mxu0 %vm103_vm0, %v91_v13  ;;  %3510 = vmatprep.subr.mxu1 %v3843_v10 }
  0x40   :  { %3487 = vmatmul.mubr.msk.f32.gmra.mxu1 %vm103_vm0, %v82_v16 }
  0x41   :  { %3489 = vmatprep.mubr.msk.f32.mxu1 %vm103_vm0, %v83_v18 }
  0x42   :  { %3474 = vmatmul.mubr.msk.f32.gmra.mxu0 %vm103_vm0, %v92_v15 }
  0x43   :  { %3476 = vmatprep.mubr.msk.f32.mxu0 %vm103_vm0, %v93_v17 }
  0x44   :  { %3490 = vmatmul.mubr.msk.f32.gmra.mxu1 %vm103_vm0, %v84_v20 }
  0x45   :  { %3492 = vmatprep.mubr.msk.f32.mxu1 %vm103_vm0, %v85_v21 }
  0x46   :  { %3477 = vmatmul.mubr.msk.f32.gmra.mxu0 %vm103_vm0, %v94_v19 }
  0x47   :  { %3497 = vmatprep.mubr.msk.f32.mxu0 %vm3844_vm1, %v3843_v10 }
  0x48   :  { %3493 = vmatmul.mubr.msk.f32.gmra.mxu1 %vm103_vm0, %v86_v22 }
  0x49   :  { %3502 = vmatprep.mubr.msk.f32.mxu1 %vm3844_vm1, %v3843_v10 }
  0xfa   :  { %v3938_v23 = vpop.f32.mrf.mxu0 }
  0xfb   :  { %1101 = vrot.lane.b32.xlu0 %v3938_v23, %s3845_s2  ;;  %3503 = vmatmul.mubr.msk.f32.vlgmr.msra.gmra.mxu1 %vm103_vm0, %v3938_v23 }
  0xfc   :  { %v3944_v24 = vpop.f32.mrf.mxu0  ;;  %3511 = vmatpush3.xpose.msk.msra.mxu1 %vm103_vm0, %v82_v16  ;;  %3512 = vmatprep.mubr.msk.f32.mxu1 %vm3844_vm1, %v3843_v10  ;;  %v4016_v33 = vpop.f32.mrf.mxu1 }
  0xfd   :  { %3498 = vmatmul.mubr.msk.f32.vlgmr.msra.gmra.mxu0 %vm103_vm0, %v3944_v24  ;;  %3520 = vmatprep.subr.mxu1 %v3843_v10 }
  0xfe   :  { %v3952_v25 = vpop.f32.mrf.mxu0  ;;  %3506 = vmatpush3.xpose.msk.msra.mxu0 %vm103_vm0, %v81_v14  ;;  %3507 = vmatprep.mubr.msk.f32.mxu0 %vm3844_vm1, %v3843_v10  ;;  %v4018_v34 = vpop.f32.mrf.mxu1 }
  0xff   :  { %992 = vrot.lane.b32.xlu0 %v3944_v24, %s3845_s2  ;;  %1317 = vrot.lane.b32.xlu1 %v3952_v25, %s3845_s2 }
 0x100   :  { %3513 = vmatmul.mubr.msk.f32.vlgmr.msra.gmra.mxu1 %vm103_vm0, %v3952_v25  ;;  %v3963_v26 = vpop.f32.mrf.mxu0  ;;  %3515 = vmatprep.subr.mxu0 %v3843_v10  ;;  %v4020_v35 = vpop.f32.mrf.mxu1 }
 0x101   :  { %3521 = vmatpush3.xpose.msk.msra.mxu1 %vm103_vm0, %v84_v20  ;;  %3508 = vmatmul.mubr.msk.f32.vlgmr.msra.gmra.mxu0 %vm103_vm0, %v3963_v26 }
 0x102   :  { %v3969_v27 = vpop.f32.mrf.mxu0  ;;  %3516 = vmatpush3.xpose.msk.msra.mxu0 %vm103_vm0, %v83_v18  ;;  %3522 = vmatprep.mubr.msk.f32.mxu1 %vm3844_vm1, %v3843_v10  ;;  %v4022_v36 = vpop.f32.mrf.mxu1 }
 0x103   :  { %1209 = vrot.lane.b32.xlu1 %v3963_v26, %s3845_s2  ;;  %3530 = vmatprep.subr.mxu1 %v3843_v10 }
 0x104   :  { %3523 = vmatmul.mubr.msk.f32.vlgmr.msra.gmra.mxu1 %vm103_vm0, %v3969_v27  ;;  %v3979_v28 = vpop.f32.mrf.mxu0  ;;  %3517 = vmatprep.mubr.msk.f32.mxu0 %vm3844_vm1, %v3843_v10  ;;  %v4024_v37 = vpop.f32.mrf.mxu1 }
 0x105   :  { %3531 = vmatpush3.xpose.msk.msra.mxu1 %vm103_vm0, %v86_v22  ;;  %1425 = vrot.lane.b32.xlu0 %v3979_v28, %s3845_s2 }
 0x106   :  { %3518 = vmatmul.mubr.msk.f32.vlgmr.msra.gmra.mxu0 %vm103_vm0, %v3979_v28  ;;  %3525 = vmatprep.subr.mxu0 %v3843_v10  ;;  %v3989_v29 = vpop.f32.mrf.mxu0  ;;  %v4026_v38 = vpop.f32.mrf.mxu1 }
 0x107   :  { %3526 = vmatpush3.xpose.msk.msra.mxu0 %vm103_vm0, %v85_v21  ;;  %3532 = vmatprep.mubr.msk.f32.mxu1 %vm3844_vm1, %v3843_v10 }
 0x108   :  { %1533 = vrot.lane.b32.xlu1 %v3969_v27, %s3845_s2  ;;  %3533 = vmatmul.mubr.msk.f32.vlgmr.msra.gmra.mxu1 %vm103_vm0, %v3989_v29  ;;  %v3998_v30 = vpop.f32.mrf.mxu0  ;;  %v4028_v39 = vpop.f32.mrf.mxu1 }
 0x109   :  { %3527 = vmatprep.mubr.msk.f32.mxu0 %vm3844_vm1, %v3843_v10  ;;  %1641 = vrot.lane.b32.xlu0 %v3998_v30, %s3845_s2 }
 0x10a   :  { %3528 = vmatmul.mubr.msk.f32.vlgmr.msra.gmra.mxu0 %vm103_vm0, %v3998_v30  ;;  %3540 = vmatprep.subr.mxu1 %v3843_v10  ;;  %v4030_v40 = vpop.f32.mrf.mxu1 }
 0x10b   :  { %3535 = vmatprep.subr.mxu0 %v3843_v10  ;;  %3542 = vmatprep.mubr.msk.f32.mxu1 %vm3844_vm1, %v3843_v10 }
 0x10c   :  { %1749 = vrot.lane.b32.xlu1 %v3989_v29, %s3845_s2  ;;  %3537 = vmatprep.mubr.msk.f32.mxu0 %vm3844_vm1, %v3843_v10 }
 0x16d   :  { %v1102_v31 = vpop.permute.xlu0 %1101 }
 0x16e   :  { %3541 = vmatpush3.msra.mxu1 %v1102_v31 }
 0x16f   :  { %3550 = vmatprep.subr.mxu1 %v3843_v10 }
 0x171   :  { %v993_v32 = vpop.permute.xlu0 %992  ;;  %v1318_v1 = vpop.permute.xlu1 %1317 }
 0x172   :  { %3536 = vmatpush3.msra.mxu0 %v993_v32 }
 0x173   :  { %3545 = vmatprep.subr.mxu0 %v3843_v10 }
 0x175   :  { %v1210_v2 = vpop.permute.xlu1 %1209 }
 0x177   :  { %v1426_v4 = vpop.permute.xlu0 %1425 }
 0x17a   :  { %v1534_v3 = vpop.permute.xlu1 %1533 }
 0x17b   :  { %v1642_v6 = vpop.permute.xlu0 %1641 }
 0x17e   :  { %v1750_v5 = vpop.permute.xlu1 %1749 }
 0x1bb   :  { %v510_v41 = vpop.f32.mrf.mxu1 }
 0x1bc   :  { %3629 = vtanh.f32 %v510_v41 }
 0x1bd   :  { %v437_v42 = vpop.f32.mrf.mxu0  ;;  %v3504_v43 = vpop.f32.mrf.mxu1 }
 0x1be   :  { %3631 = vtanh.f32 %v437_v42 }
 0x1bf   :  { %v3499_v44 = vpop.f32.mrf.mxu0 }
 0x1c0   :  { %v656_v45 = vpop.f32.mrf.mxu1 }
 0x1c1   :  { %3633 = vtanh.f32 %v656_v45  ;;  %v583_v46 = vpop.f32.mrf.mxu0 }
 0x1c2   :  { %v3514_v47 = vpop.f32.mrf.mxu1 }
 0x1c3   :  { %v3509_v48 = vpop.f32.mrf.mxu0 }
 0x1c4   :  { %v802_v49 = vpop.f32.mrf.mxu1 }
 0x1c5   :  { %3635 = vtanh.f32 %v802_v49 }
 0x1c6   :  { %3637 = vtanh.f32 %v583_v46  ;;  %v729_v50 = vpop.f32.mrf.mxu0  ;;  %v3524_v51 = vpop.f32.mrf.mxu1 }
 0x1c8   :  { %v3519_v52 = vpop.f32.mrf.mxu0  ;;  %v948_v53 = vpop.f32.mrf.mxu1 }
 0x1c9   :  { %v4032_v54 = vpop.eup %3629  ;;  %3639 = vtanh.f32 %v948_v53 }
 0x1ca   :  { %3641 = vtanh.f32 %v729_v50  ;;  %v875_v55 = vpop.f32.mrf.mxu0  ;;  %v3534_v56 = vpop.f32.mrf.mxu1  ;;  %1069 = vxpose.xlu1.b32.start.end [1/1] (short) (narrow) %v4032_v54, 8 }
 0x1cb   :  { %v4035_v57 = vpop.eup %3631  ;;  %3643 = vtanh.f32 %v875_v55 }
 0x1cc   :  { %v3529_v58 = vpop.f32.mrf.mxu0  ;;  %960 = vxpose.xlu0.b32.start.end [1/1] (short) (narrow) %v4035_v57, 8 }
 0x1ce   :  { %v4038_v59 = vpop.eup %3633 }
 0x1d0   :  { %1285 = vxpose.xlu0.b32.start.end [1/1] (short) (narrow) %v4038_v59, 8 }
 0x1d2   :  { %v4041_v60 = vpop.eup %3635 }
 0x1d3   :  { %v4043_v61 = vpop.eup %3637  ;;  %1501 = vxpose.xlu1.b32.start.end [1/1] (short) (narrow) %v4041_v60, 8 }
 0x1d4   :  { %1177 = vxpose.xlu0.b32.start.end [1/1] (short) (narrow) %v4043_v61, 8 }
 0x1d6   :  { %v4047_v62 = vpop.eup %3639 }
 0x1d7   :  { %v4049_v63 = vpop.eup %3641  ;;  %1717 = vxpose.xlu1.b32.start.end [1/1] (short) (narrow) %v4047_v62, 8 }
 0x1d8   :  { %1393 = vxpose.xlu0.b32.start.end [1/1] (short) (narrow) %v4049_v63, 8  ;;  %v4053_v0 = vpop.eup %3643 }
 0x1dc   :  { %1609 = vxpose.xlu0.b32.start.end [1/1] (short) (narrow) %v4053_v0, 8 }
 0x246   :  { %v1085_v7 = vpop.trf.xlu1 }
 0x247   :  { %3543 = vmatmul.mubr.msk.f32.vlgmr.msra.gmra.mxu1 %vm995_vm2, %v1085_v7 }
 0x248   :  { %3551 = vmatpush3.msra.mxu1 %v1318_v1  ;;  %v976_v8 = vpop.trf.xlu0  ;;  %3552 = vmatprep.mubr.msk.f32.mxu1 %vm3844_vm1, %v3843_v10 }
 0x249   :  { %3538 = vmatmul.mubr.msk.f32.vlgmr.msra.gmra.mxu0 %vm995_vm2, %v976_v8  ;;  %3560 = vmatprep.subr.mxu1 %v3843_v10 }
 0x24a   :  { %3546 = vmatpush3.msra.mxu0 %v1210_v2  ;;  %3547 = vmatprep.mubr.msk.f32.mxu0 %vm3844_vm1, %v3843_v10 }
 0x24b   :  { %3555 = vmatprep.subr.mxu0 %v3843_v10 }
 0x24c   :  { %v1301_v9 = vpop.trf.xlu0 }
 0x24d   :  { %3553 = vmatmul.mubr.msk.f32.vlgmr.msra.gmra.mxu1 %vm995_vm2, %v1301_v9 }
 0x24e   :  { %3561 = vmatpush3.msra.mxu1 %v1534_v3  ;;  %3562 = vmatprep.mubr.msk.f32.mxu1 %vm3844_vm1, %v3843_v10 }
 0x24f   :  { %3570 = vmatprep.subr.mxu1 %v3843_v10  ;;  %v1517_v11 = vpop.trf.xlu1 }
 0x250   :  { %v1193_v12 = vpop.trf.xlu0 }
 0x251   :  { %3548 = vmatmul.mubr.msk.f32.vlgmr.msra.gmra.mxu0 %vm995_vm2, %v1193_v12  ;;  %3563 = vmatmul.mubr.msk.f32.vlgmr.msra.gmra.mxu1 %vm995_vm2, %v1517_v11 }
 0x252   :  { %3556 = vmatpush3.msra.mxu0 %v1426_v4  ;;  %3571 = vmatpush3.msra.mxu1 %v1750_v5 }
 0x253   :  { %3557 = vmatprep.mubr.msk.f32.mxu0 %vm3844_vm1, %v3843_v10  ;;  %3565 = vmatprep.subr.mxu0 %v3843_v10  ;;  %v1733_v13 = vpop.trf.xlu1 }
 0x254   :  { %v1409_v14 = vpop.trf.xlu0  ;;  %3572 = vmatprep.mubr.msk.f32.mxu1 %vm3844_vm1, %v3843_v10  ;;  %3580 = vmatprep.subr.mxu1 %v3843_v10 }
 0x255   :  { %3558 = vmatmul.mubr.msk.f32.vlgmr.msra.gmra.mxu0 %vm995_vm2, %v1409_v14  ;;  %3573 = vmatmul.mubr.msk.f32.vlgmr.msra.gmra.mxu1 %vm995_vm2, %v1733_v13 }
 0x256   :  { %3566 = vmatpush3.msra.mxu0 %v1642_v6  ;;  %3581 = vmatpush3.msra.mxu1 %v4016_v33  ;;  %v3388_v6 = vld [vmem:[%s4526_s5] ss:$0 sm:$0xff]  ;;  %s3848_s5 = smov [#allocation10]  }
 0x257   :  { %3567 = vmatprep.mubr.msk.f32.mxu0 %vm3844_vm1, %v3843_v10  ;;  %3575 = vmatprep.subr.mxu0 %v3843_v10  ;;  %s3326_s20 = sshll.u32 %s3848_s5, 4  ;;  %s3327_s20 = int_to_ptr.vmem [resolvable:$true] %s3326_s20 }
 0x258   :  { %v1625_v15 = vpop.trf.xlu0  ;;  %3582 = vmatprep.mubr.msk.f32.mxu1 %vm3844_vm1, %v3843_v10  ;;  %3590 = vmatprep.subr.mxu1 %v3843_v10  ;;  %s3809_s21 = scalar_lea.vmem %s3327_s20, 128  ;;  %p3814_p7 = scmp.lt.s32.totalorder %s3327_s20, %s3327_s20 }
 0x259   :  { %3568 = vmatmul.mubr.msk.f32.vlgmr.msra.gmra.mxu0 %vm995_vm2, %v1625_v15  ;;  %3583 = vmatmul.mubr.msk.f32.vlgmr.msra.gmra.mxu1 %vm995_vm2, %v4032_v54  ;;  %p3810_p6 = scmp.ne.s32.totalorder %s3327_s20, %s3809_s21  ;;  %p3815_p8 = scmp.lt.s32.totalorder %s3809_s21, %s3809_s21 }
 0x25a   :  { %3576 = vmatpush3.msra.mxu0 %v4018_v34  ;;  %3591 = vmatpush3.msra.mxu1 %v4020_v35 }
 0x25b   :  { %3577 = vmatprep.mubr.msk.f32.mxu0 %vm3844_vm1, %v3843_v10  ;;  %3585 = vmatprep.subr.mxu0 %v3843_v10  ;;  %p3816_p9 = por %p3815_p8, %p3814_p7 }
 0x25c   :  { %3592 = vmatprep.mubr.msk.f32.mxu1 %vm3844_vm1, %v3843_v10  ;;  %3600 = vmatprep.subr.mxu1 %v3843_v10 }
 0x25d   :  { %3578 = vmatmul.mubr.msk.f32.vlgmr.msra.gmra.mxu0 %vm995_vm2, %v4035_v57  ;;  %3593 = vmatmul.mubr.msk.f32.vlgmr.msra.gmra.mxu1 %vm995_vm2, %v4038_v59  ;;  %p3817_p10 = pnand %p3816_p9, %p3810_p6 }
 0x25e   :  { %3586 = vmatpush3.msra.mxu0 %v4022_v36  ;;  %3601 = vmatpush3.msra.mxu1 %v4024_v37 }
 0x25f   :  { %3587 = vmatprep.mubr.msk.f32.mxu0 %vm3844_vm1, %v3843_v10  ;;  %3595 = vmatprep.subr.mxu0 %v3843_v10 }
 0x260   :  { %3602 = vmatprep.mubr.msk.f32.mxu1 %vm3844_vm1, %v3843_v10  ;;  %3610 = vmatprep.subr.mxu1 %v3843_v10 }
 0x261   :  { %3588 = vmatmul.mubr.msk.f32.vlgmr.msra.gmra.mxu0 %vm995_vm2, %v4043_v61  ;;  %3603 = vmatmul.mubr.msk.f32.vlgmr.msra.gmra.mxu1 %vm995_vm2, %v4041_v60 }
 0x262   :  { %3596 = vmatpush3.msra.mxu0 %v4026_v38  ;;  %3611 = vmatpush3.msra.mxu1 %v4028_v39 }
 0x263   :  { %3597 = vmatprep.mubr.msk.f32.mxu0 %vm3844_vm1, %v3843_v10  ;;  %3605 = vmatprep.subr.mxu0 %v3843_v10 }
 0x264   :  { %3612 = vmatprep.mubr.msk.f32.mxu1 %vm3844_vm1, %v3843_v10 }
 0x265   :  { %3598 = vmatmul.mubr.msk.f32.vlgmr.msra.gmra.mxu0 %vm995_vm2, %v4049_v63  ;;  %3613 = vmatmul.mubr.msk.f32.vlgmr.msra.gmra.mxu1 %vm995_vm2, %v4047_v62 }
 0x266   :  { %3606 = vmatpush3.msra.mxu0 %v4030_v40  ;;  %3607 = vmatprep.mubr.msk.f32.mxu0 %vm3844_vm1, %v3843_v10 }
 0x269   :  { %3608 = vmatmul.mubr.msk.f32.vlgmr.msra.gmra.mxu0 %vm995_vm2, %v4053_v0 }
 0x307   :  { %v4128_v16 = vpop.f32.mrf.mxu1 }
 0x309   :  { %v4130_v17 = vpop.f32.mrf.mxu0  ;;  %v3544_v18 = vpop.f32.mrf.mxu1 }
 0x30b   :  { %v3539_v19 = vpop.f32.mrf.mxu0 }
 0x30d   :  { %v4132_v20 = vpop.f32.mrf.mxu1 }
 0x30f   :  { %v3554_v21 = vpop.f32.mrf.mxu1 }
 0x311   :  { %v4134_v22 = vpop.f32.mrf.mxu0  ;;  %v1605_v31 = vpop.f32.mrf.mxu1 }
 0x312   :  { %v1830_v32 = vadd.f32 %v4024_v37, %v1605_v31 }
 0x313   :  { %v3549_v41 = vpop.f32.mrf.mxu0  ;;  %v3564_v42 = vpop.f32.mrf.mxu1 }
 0x314   :  { %3645 = vtanh.f32 %v1830_v32 }
 0x315   :  { %v4137_v10 = vpop.f32.mrf.mxu0  ;;  %v1821_v43 = vpop.f32.mrf.mxu1 }
 0x316   :  { %v1832_v44 = vadd.f32 %v4028_v39, %v1821_v43 }
 0x317   :  { %v3559_v45 = vpop.f32.mrf.mxu0  ;;  %v3574_v46 = vpop.f32.mrf.mxu1 }
 0x318   :  { %3647 = vtanh.f32 %v1832_v44 }
 0x319   :  { %v1713_v47 = vpop.f32.mrf.mxu0  ;;  %v1983_v48 = vpop.f32.mrf.mxu1 }
 0x31a   :  { %v1831_v49 = vadd.f32 %v1713_v47, %v4030_v40  ;;  %2435 = vrot.lane.b32.xlu1 %v1983_v48, %s3846_s3  ;;  %v4148_v40 = vld [vmem:[%s4525_s4] ss:$0 sm:$0xff] }
 0x31b   :  { %v3569_v50 = vpop.f32.mrf.mxu0  ;;  %v3584_v37 = vpop.f32.mrf.mxu1 }
 0x31c   :  { %3649 = vtanh.f32 %v1831_v49 }
 0x31d   :  { %v1910_v51 = vpop.f32.mrf.mxu0  ;;  %v2129_v52 = vpop.f32.mrf.mxu1 }
 0x31e   :  { %2433 = vrot.lane.b32.xlu0 %v1910_v51, %s3846_s3  ;;  %2439 = vrot.lane.b32.xlu1 %v2129_v52, %s3846_s3  ;;  %v1826_v52 = vadd.f32 %v4016_v33, %v4128_v16 }
 0x31f   :  { %v3579_v39 = vpop.f32.mrf.mxu0  ;;  %v3594_v53 = vpop.f32.mrf.mxu1 }
 0x320   :  { %v1825_v39 = vadd.f32 %v4130_v17, %v4018_v34  ;;  %v1827_v53 = vadd.f32 %v4134_v22, %v4022_v36 }
 0x321   :  { %v2056_v54 = vpop.f32.mrf.mxu0  ;;  %v2275_v55 = vpop.f32.mrf.mxu1 }
 0x322   :  { %v3646_v56 = vpop.eup %3645  ;;  %2437 = vrot.lane.b32.xlu1 %v2056_v54, %s3846_s3  ;;  %v1828_v54 = vadd.f32 %v4020_v35, %v4132_v20 }
 0x323   :  { %v3589_v57 = vpop.f32.mrf.mxu0  ;;  %v3604_v58 = vpop.f32.mrf.mxu1  ;;  %v4151_v59 = vmul.f32 %v3646_v56, %v4148_v40 }
 0x325   :  { %v2202_v60 = vpop.f32.mrf.mxu0  ;;  %v2421_v61 = vpop.f32.mrf.mxu1 }
 0x326   :  { %v3648_v62 = vpop.eup %3647  ;;  %2441 = vrot.lane.b32.xlu0 %v2202_v60, %s3846_s3  ;;  %2443 = vrot.lane.b32.xlu1 %v2275_v55, %s3846_s3  ;;  %v1829_v55 = vadd.f32 %v4137_v10, %v4026_v38 }
 0x327   :  { %v3599_v63 = vpop.f32.mrf.mxu0  ;;  %v3614_v0 = vpop.f32.mrf.mxu1  ;;  %v4156_v1 = vmul.f32 %v3648_v62, %v4148_v40 }
 0x329   :  { %v3650_v2 = vpop.eup %3649  ;;  %v2348_v3 = vpop.f32.mrf.mxu0 }
 0x32a   :  { %2445 = vrot.lane.b32.xlu0 %v2348_v3, %s3846_s3  ;;  %2447 = vrot.lane.b32.xlu1 %v2421_v61, %s3846_s3  ;;  %v4161_v4 = vmul.f32 %v3650_v2, %v4148_v40 }
 0x32b   :  { %v3609_v5 = vpop.f32.mrf.mxu0 }
 0x32e   :  { %2517 = vrot.lane.b32.xlu0 %v3388_v6, %s3846_s3 }
 0x38c   :  { %v2436_v7 = vpop.permute.xlu1 %2435 }
 0x38d   :  { %v2458_v8 = vadd.f32 %v3938_v23, %v2436_v7 }
 0x38f   :  { %3651 = vtanh.f32 %v2458_v8 }
 0x390   :  { %v2434_v9 = vpop.permute.xlu0 %2433  ;;  %v2440_v11 = vpop.permute.xlu1 %2439 }
 0x391   :  { %v2457_v12 = vadd.f32 %v2434_v9, %v3944_v24  ;;  %v2460_v13 = vadd.f32 %v3952_v25, %v2440_v11 }
 0x393   :  { %3653 = vtanh.f32 %v2457_v12 }
 0x394   :  { %v2438_v14 = vpop.permute.xlu1 %2437  ;;  %3655 = vtanh.f32 %v2460_v13 }
 0x395   :  { %v2459_v15 = vadd.f32 %v2438_v14, %v3963_v26 }
 0x397   :  { %3657 = vtanh.f32 %v2459_v15 }
 0x398   :  { %v2442_v18 = vpop.permute.xlu0 %2441  ;;  %v2444_v19 = vpop.permute.xlu1 %2443 }
 0x399   :  { %v2461_v21 = vadd.f32 %v2442_v18, %v3979_v28  ;;  %v2462_v31 = vadd.f32 %v3969_v27, %v2444_v19  ;;  %v2503_v18 = vsel %vm2487_vm3, %v4151_v59, 0.0  ;;  %v2506_v19 = vsel %vm2487_vm3, %v4161_v4, 0.0 }
 0x39a   :  { %v2592_v59 = vlaneseq }
 0x39b   :  { %3659 = vtanh.f32 %v2461_v21  ;;  %v2509_v21 = vsel %vm2487_vm3, %v4156_v1, 0.0 }
 0x39c   :  { %3661 = vtanh.f32 %v2462_v31  ;;  %v2446_v23 = vpop.permute.xlu0 %2445  ;;  %v2448_v32 = vpop.permute.xlu1 %2447 }
 0x39d   :  { %v2463_v24 = vadd.f32 %v2446_v23, %v3998_v30  ;;  %v2464_v25 = vadd.f32 %v3989_v29, %v2448_v32  ;;  %v3652_v41 = vpop.eup %3651 }
 0x39f   :  { %3663 = vtanh.f32 %v2463_v24 }
 0x3a0   :  { %v3654_v42 = vpop.eup %3653  ;;  %3665 = vtanh.f32 %v2464_v25  ;;  %v2518_v26 = vpop.permute.xlu0 %2517 }
 0x3a1   :  { %v2521_v43 = vmul.f32 %v3652_v41, %v2518_v26  ;;  %v2520_v44 = vmul.f32 %v3654_v42, %v2518_v26  ;;  %v3656_v45 = vpop.eup %3655  ;;  %3667 = vtanh.f32 %v1826_v52  ;;  %v2593_v42 = vand.u32 127, %v2592_v59 }
 0x3a2   :  { %v2523_v28 = vmul.f32 %v3656_v45, %v2518_v26  ;;  %3669 = vtanh.f32 %v1825_v39 }
 0x3a3   :  { %2538 = vrot.lane.b32.xlu0 %v2521_v43, %s3845_s2  ;;  %2536 = vrot.lane.b32.xlu1 %v2520_v44, %s3845_s2  ;;  %3671 = vtanh.f32 %v1827_v53 }
 0x3a4   :  { %v3658_v27 = vpop.eup %3657  ;;  %3673 = vtanh.f32 %v1828_v54 }
 0x3a5   :  { %v2522_v46 = vmul.f32 %v3658_v27, %v2518_v26  ;;  %3675 = vtanh.f32 %v1829_v55 }
 0x3a7   :  { %2542 = vrot.lane.b32.xlu0 %v2523_v28, %s3845_s2  ;;  %2540 = vrot.lane.b32.xlu1 %v2522_v46, %s3845_s2 }
 0x3a8   :  { %v3660_v29 = vpop.eup %3659 }
 0x3a9   :  { %v3662_v30 = vpop.eup %3661  ;;  %v2524_v47 = vmul.f32 %v3660_v29, %v2518_v26 }
 0x3aa   :  { %v2525_v48 = vmul.f32 %v3662_v30, %v2518_v26 }
 0x3ab   :  { %2544 = vrot.lane.b32.xlu1 %v2524_v47, %s3845_s2 }
 0x3ac   :  { %v3664_v49 = vpop.eup %3663  ;;  %2546 = vrot.lane.b32.xlu0 %v2525_v48, %s3845_s2 }
 0x3ad   :  { %v3666_v50 = vpop.eup %3665  ;;  %v2526_v37 = vmul.f32 %v3664_v49, %v2518_v26 }
 0x3ae   :  { %v2527_v51 = vmul.f32 %v3666_v50, %v2518_v26  ;;  %v3668_v56 = vpop.eup %3667  ;;  %v4231_v26 = vshrl.u32 %v2592_v59, 7 }
 0x3af   :  { %2548 = vrot.lane.b32.xlu1 %v2526_v37, %s3845_s2  ;;  %v3670_v57 = vpop.eup %3669  ;;  %v2480_v33 = vmul.f32 %v3668_v56, %v4148_v40 }
 0x3b0   :  { %2550 = vrot.lane.b32.xlu0 %v2527_v51, %s3845_s2  ;;  %v3672_v16 = vpop.eup %3671  ;;  %v2479_v22 = vmul.f32 %v3670_v57, %v4148_v40  ;;  %v4238_v44 = vsub.s32 %v2593_v42, %v4231_v26 }
 0x3b1   :  { %v3674_v34 = vpop.eup %3673  ;;  %v2491_v17 = vsel %vm2487_vm3, %v2480_v33, 0.0  ;;  %v2481_v36 = vmul.f32 %v3672_v16, %v4148_v40 }
 0x3b2   :  { %v3676_v35 = vpop.eup %3675  ;;  %v2488_v38 = vsel %vm2487_vm3, %v2479_v22, 0.0  ;;  %v2482_v58 = vmul.f32 %v3674_v34, %v4148_v40 }
 0x3b3   :  { %v2494_v20 = vsel %vm2487_vm3, %v2481_v36, 0.0  ;;  %v2483_v10 = vmul.f32 %v3676_v35, %v4148_v40 }
 0x3b4   :  { %v2497_v61 = vsel %vm2487_vm3, %v2482_v58, 0.0 }
 0x3b5   :  { %v2500_v60 = vsel %vm2487_vm3, %v2483_v10, 0.0 }
 0x3cf   :  { %2492 = vadd.xlane.f32.xlu0 %v2491_v17 }
 0x3d3   :  { %2495 = vadd.xlane.f32.xlu0 %v2494_v20  ;;  %2489 = vadd.xlane.f32.xlu1 %v2488_v38 }
 0x3d7   :  { %2501 = vadd.xlane.f32.xlu0 %v2500_v60  ;;  %2498 = vadd.xlane.f32.xlu1 %v2497_v61 }
 0x415   :  { %v2539_v62 = vpop.permute.xlu0 %2538  ;;  %v2537_v63 = vpop.permute.xlu1 %2536 }
 0x416   :  { %v2563_v0 = vsel %vm2487_vm3, %v2539_v62, 0.0  ;;  %v2560_v2 = vsel %vm2487_vm3, %v2537_v63, 0.0 }
 0x417   :  { %2564 = vadd.xlane.f32.xlu0 %v2563_v0  ;;  %2561 = vadd.xlane.f32.xlu1 %v2560_v2 }
 0x419   :  { %v2543_v3 = vpop.permute.xlu0 %2542  ;;  %v2541_v5 = vpop.permute.xlu1 %2540 }
 0x41a   :  { %v2569_v40 = vsel %vm2487_vm3, %v2543_v3, 0.0  ;;  %v2566_v6 = vsel %vm2487_vm3, %v2541_v5, 0.0 }
 0x41b   :  { %2570 = vadd.xlane.f32.xlu0 %v2569_v40  ;;  %2567 = vadd.xlane.f32.xlu1 %v2566_v6  ;;  %v3847_v6 = vmov 0  }
 0x41c   :  { %3628 = vset.pattern.permute.xlu0 %v3847_v6  ;;  %3627 = vset.pattern.permute.xlu1 %v3847_v6 }
 0x41d   :  { %v2545_v7 = vpop.permute.xlu1 %2544 }
 0x41e   :  { %v2547_v8 = vpop.permute.xlu0 %2546  ;;  %v2572_v9 = vsel %vm2487_vm3, %v2545_v7, 0.0  ;;  %v4303_v7 = vsub.s32 0, %v4231_v26 }
 0x41f   :  { %v2575_v11 = vsel %vm2487_vm3, %v2547_v8, 0.0  ;;  %2573 = vadd.xlane.f32.xlu1 %v2572_v9  ;;  %v4306_v8 = vsub.s32 1, %v4231_v26  ;;  %v4309_v9 = vsub.s32 2, %v4231_v26 }
 0x420   :  { %2576 = vadd.xlane.f32.xlu0 %v2575_v11  ;;  %v4312_v11 = vsub.s32 3, %v4231_v26 }
 0x421   :  { %v2549_v12 = vpop.permute.xlu1 %2548 }
 0x422   :  { %v2551_v13 = vpop.permute.xlu0 %2550  ;;  %v2578_v14 = vsel %vm2487_vm3, %v2549_v12, 0.0 }
 0x423   :  { %v2581_v15 = vsel %vm2487_vm3, %v2551_v13, 0.0  ;;  %2579 = vadd.xlane.f32.xlu1 %v2578_v14 }
 0x424   :  { %2582 = vadd.xlane.f32.xlu0 %v2581_v15 }
 0x427   :  { %2504 = vadd.xlane.f32.xlu1 %v2503_v18  ;;  %v4318_v18 = vsub.s32 4, %v4231_v26 }
 0x428   :  { %2507 = vadd.xlane.f32.xlu0 %v2506_v19 }
 0x42b   :  { %2510 = vadd.xlane.f32.xlu1 %v2509_v21 }
 0x458   :  { %v4217_v31 = vpop.xlane.xlu0 %2492 }
 0x459   :  { %v2601_v28 = vrot.slane %v4217_v31, %v4238_v44 }
 0x45c   :  { %v4219_v23 = vpop.xlane.xlu0 %2495  ;;  %v4221_v32 = vpop.xlane.xlu1 %2489 }
 0x45d   :  { %v2597_v45 = vrot.slane %v4221_v32, %v4238_v44  ;;  %v2605_v50 = vrot.slane %v4219_v23, %v4238_v44 }
 0x45f   :  { %v2627_v48 = vsel %vm2626_vm4, %v2601_v28, %v2597_v45 }
 0x460   :  { %v4223_v24 = vpop.xlane.xlu0 %2501  ;;  %v4225_v25 = vpop.xlane.xlu1 %2498  ;;  %v2629_v53 = vsel %vm2628_vm5, %v2605_v50, %v2627_v48 }
 0x461   :  { %v2609_v49 = vrot.slane %v4225_v25, %v4238_v44  ;;  %v2613_v57 = vrot.slane %v4223_v24, %v4238_v44 }
 0x463   :  { %v2631_v56 = vsel %vm2630_vm6, %v2609_v49, %v2629_v53 }
 0x464   :  { %v2633_v38 = vsel %vm2632_vm7, %v2613_v57, %v2631_v56  ;;  %v4345_v56 = vsub.s32 7, %v4231_v26 }
 0x4a0   :  { %v4227_v41 = vpop.xlane.xlu0 %2564  ;;  %v4229_v4 = vpop.xlane.xlu1 %2561 }
 0x4a1   :  { %v2849_v46 = vrot.slane %v4227_v41, %v4238_v44  ;;  %v2845_v29 = vrot.slane %v4229_v4, %v4238_v44 }
 0x4a3   :  { %v2874_v51 = vsel %vm2626_vm4, %v2849_v46, %v2845_v29  ;;  %v4327_v29 = vsub.s32 5, %v4231_v26 }
 0x4a4   :  { %v4233_v1 = vpop.xlane.xlu0 %2570  ;;  %v4235_v43 = vpop.xlane.xlu1 %2567 }
 0x4a5   :  { %v2853_v47 = vrot.slane %v4235_v43, %v4238_v44  ;;  %v2857_v52 = vrot.slane %v4233_v1, %v4238_v44 }
 0x4a7   :  { %v2875_v54 = vsel %vm2628_vm5, %v2853_v47, %v2874_v51 }
 0x4a8   :  { %v4242_v27 = vpop.xlane.xlu1 %2573  ;;  %v2876_v34 = vsel %vm2630_vm6, %v2857_v52, %v2875_v54 }
 0x4a9   :  { %v4250_v30 = vpop.xlane.xlu0 %2576  ;;  %v2861_v55 = vrot.slane %v4242_v27, %v4238_v44 }
 0x4aa   :  { %v2865_v16 = vrot.slane %v4250_v30, %v4238_v44 }
 0x4ab   :  { %v2877_v22 = vsel %vm2632_vm7, %v2861_v55, %v2876_v34 }
 0x4ac   :  { %v4259_v37 = vpop.xlane.xlu1 %2579  ;;  %v2878_v62 = vsel %vm2634_vm8, %v2865_v16, %v2877_v22 }
 0x4ad   :  { %v4264_v39 = vpop.xlane.xlu0 %2582  ;;  %v2869_v35 = vrot.slane %v4259_v37, %v4238_v44 }
 0x4ae   :  { %v2873_v60 = vrot.slane %v4264_v39, %v4238_v44 }
 0x4af   :  { %v2879_v0 = vsel %vm2636_vm9, %v2869_v35, %v2878_v62 }
 0x4b0   :  { %v4273_v33 = vpop.xlane.xlu1 %2504  ;;  %v2880_v5 = vsel %vm2638_vm10, %v2873_v60, %v2879_v0 }
 0x4b1   :  { %v4278_v17 = vpop.xlane.xlu0 %2507  ;;  %v2617_v36 = vrot.slane %v4273_v33, %v4238_v44  ;;  %v2882_v40 = vsel %vm995_vm2, %v2880_v5, -inf }
 0x4b2   :  { %v2621_v20 = vrot.slane %v4278_v17, %v4238_v44 }
 0x4b3   :  { %v2635_v10 = vsel %vm2634_vm8, %v2617_v36, %v2633_v38 }
 0x4b4   :  { %v4289_v58 = vpop.xlane.xlu1 %2510  ;;  %v2637_v63 = vsel %vm2636_vm9, %v2621_v20, %v2635_v10 }
 0x4b5   :  { %v2625_v61 = vrot.slane %v4289_v58, %v4238_v44 }
 0x4b7   :  { %v2639_v2 = vsel %vm2638_vm10, %v2625_v61, %v2637_v63 }
 0x4b8   :  { %v2641_v3 = vsel %vm995_vm2, %v2639_v2, -inf }
 0x4b9   :  { %2642 = vmax.xlane.f32.xlu0 %v2641_v3 }
 0x4bd   :  { %2883 = vmax.xlane.f32.xlu0 %v2882_v40 }
 0x542   :  { %v2643_v12 = vpop.xlane.xlu0 %2642 }
 0x543   :  { %v2648_v13 = vrot.slane %v2643_v12, %v4303_v7  ;;  %v2652_v14 = vrot.slane %v2643_v12, %v4306_v8  ;;  %v2656_v15 = vrot.slane %v2643_v12, %v4309_v9  ;;  %v2660_v19 = vrot.slane %v2643_v12, %v4312_v11 }
 0x544   :  { %v2664_v48 = vrot.slane %v2643_v12, %v4318_v18  ;;  %v2668_v51 = vrot.slane %v2643_v12, %v4327_v29  ;;  %v2676_v36 = vrot.slane %v2643_v12, %v4345_v56 }
 0x545   :  { %v2685_v21 = vsub.f32 %v4221_v32, %v2648_v13  ;;  %v2686_v59 = vsub.f32 %v4217_v31, %v2652_v14  ;;  %v2687_v42 = vsub.f32 %v4219_v23, %v2656_v15  ;;  %v2688_v49 = vsub.f32 %v4225_v25, %v2660_v19 }
 0x546   :  { %v4324_v45 = vpop.xlane.xlu0 %2883  ;;  %v4336_v23 = vsub.s32 6, %v4231_v26  ;;  %v2689_v52 = vsub.f32 %v4223_v24, %v2664_v48  ;;  %v2690_v16 = vsub.f32 %v4273_v33, %v2668_v51 }
 0x547   :  { %v2693_v28 = vmul.f32 1.442695, %v2685_v21  ;;  %v2695_v46 = vmul.f32 1.442695, %v2686_v59  ;;  %v2893_v47 = vrot.slane %v4324_v45, %v4306_v8  ;;  %v2697_v32 = vmul.f32 1.442695, %v2687_v42 }
 0x548   :  { %v2905_v31 = vrot.slane %v4324_v45, %v4318_v18  ;;  %v2699_v53 = vmul.f32 1.442695, %v2688_v49  ;;  %v2913_v25 = vrot.slane %v4324_v45, %v4336_v23  ;;  %v2672_v57 = vrot.slane %v2643_v12, %v4336_v23 }
 0x549   :  { %3677 = vpow2.f32 %v2693_v28  ;;  %v2927_v50 = vsub.f32 %v4227_v41, %v2893_v47  ;;  %v2701_v41 = vmul.f32 1.442695, %v2689_v52  ;;  %v2889_v59 = vrot.slane %v4324_v45, %v4303_v7 }
 0x54a   :  { %3679 = vpow2.f32 %v2695_v46  ;;  %v2930_v54 = vsub.f32 %v4242_v27, %v2905_v31  ;;  %v2932_v34 = vsub.f32 %v4259_v37, %v2913_v25  ;;  %v2691_v22 = vsub.f32 %v4278_v17, %v2672_v57 }
 0x54b   :  { %3681 = vpow2.f32 %v2697_v32  ;;  %v2936_v55 = vmul.f32 1.442695, %v2927_v50  ;;  %v2703_v27 = vmul.f32 1.442695, %v2690_v16  ;;  %v2692_v37 = vsub.f32 %v4289_v58, %v2676_v36 }
 0x54c   :  { %3683 = vpow2.f32 %v2699_v53  ;;  %v2942_v24 = vmul.f32 1.442695, %v2930_v54  ;;  %v2946_v26 = vmul.f32 1.442695, %v2932_v34  ;;  %v2705_v33 = vmul.f32 1.442695, %v2691_v22 }
 0x54d   :  { %3685 = vpow2.f32 %v2936_v55  ;;  %v2707_v17 = vmul.f32 1.442695, %v2692_v37  ;;  %v2897_v31 = vrot.slane %v4324_v45, %v4309_v9  ;;  %v2926_v50 = vsub.f32 %v4229_v4, %v2889_v59 }
 0x54e   :  { %3687 = vpow2.f32 %v2701_v41  ;;  %v2901_v57 = vrot.slane %v4324_v45, %v4312_v11  ;;  %v2909_v4 = vrot.slane %v4324_v45, %v4327_v29  ;;  %v2917_v22 = vrot.slane %v4324_v45, %v4345_v56 }
 0x54f   :  { %3689 = vpow2.f32 %v2942_v24  ;;  %v2928_v16 = vsub.f32 %v4235_v43, %v2897_v31  ;;  %v2934_v41 = vmul.f32 1.442695, %v2926_v50 }
 0x550   :  { %3691 = vpow2.f32 %v2703_v27  ;;  %v2929_v24 = vsub.f32 %v4233_v1, %v2901_v57  ;;  %v2931_v27 = vsub.f32 %v4250_v30, %v2909_v4  ;;  %v2933_v43 = vsub.f32 %v4264_v39, %v2917_v22 }
 0x551   :  { %3693 = vpow2.f32 %v2946_v26  ;;  %v2938_v36 = vmul.f32 1.442695, %v2928_v16 }
 0x552   :  { %3695 = vpow2.f32 %v2705_v33  ;;  %v2940_v26 = vmul.f32 1.442695, %v2929_v24  ;;  %v2944_v37 = vmul.f32 1.442695, %v2931_v27  ;;  %v2948_v33 = vmul.f32 1.442695, %v2933_v43 }
 0x553   :  { %3697 = vpow2.f32 %v2707_v17 }
 0x554   :  { %3699 = vpow2.f32 %v2934_v41 }
 0x555   :  { %3701 = vpow2.f32 %v2938_v36 }
 0x556   :  { %v4352_v35 = vpop.eup %3677  ;;  %3703 = vpow2.f32 %v2940_v26 }
 0x557   :  { %v4354_v20 = vpop.eup %3679  ;;  %2718 = vperm.xlu1 %3627, %v4352_v35   ;;  %3705 = vpow2.f32 %v2944_v37 }
 0x558   :  { %2721 = vperm.xlu0 %3628, %v4354_v20   ;;  %v4359_v38 = vpop.eup %3681  ;;  %3707 = vpow2.f32 %v2948_v33  ;;  %v3713_v33 = vld [vmem:[#allocation2] sm:$0xff] }
 0x559   :  { %v4362_v10 = vpop.eup %3683 }
 0x55a   :  { %v4364_v60 = vpop.eup %3685 }
 0x55b   :  { %2724 = vperm.xlu1 %3627, %v4359_v38   ;;  %v4368_v61 = vpop.eup %3687 }
 0x55c   :  { %2962 = vperm.xlu0 %3628, %v4364_v60   ;;  %v4370_v58 = vpop.eup %3689 }
 0x55d   :  { %v4374_v62 = vpop.eup %3691 }
 0x55e   :  { %v4376_v63 = vpop.eup %3693 }
 0x55f   :  { %2727 = vperm.xlu1 %3627, %v4362_v10   ;;  %v4380_v0 = vpop.eup %3695 }
 0x560   :  { %2971 = vperm.xlu0 %3628, %v4370_v58   ;;  %v4383_v2 = vpop.eup %3697 }
 0x561   :  { %v4417_v17 = vpop.eup %3699 }
 0x562   :  { %v4420_v1 = vpop.eup %3701 }
 0x563   :  { %2730 = vperm.xlu1 %3627, %v4368_v61   ;;  %v4423_v45 = vpop.eup %3703 }
 0x564   :  { %2977 = vperm.xlu0 %3628, %v4376_v63   ;;  %v4426_v30 = vpop.eup %3705 }
 0x565   :  { %v4429_v39 = vpop.eup %3707 }
 0x567   :  { %2733 = vperm.xlu1 %3627, %v4374_v62  }
 0x56b   :  { %2736 = vperm.xlu1 %3627, %v4380_v0  }
 0x56f   :  { %2739 = vperm.xlu1 %3627, %v4383_v2  }
 0x5d2   :  { %v2719_v3 = vpop.permute.xlu1 %2718 }
 0x5d3   :  { %v2722_v12 = vpop.permute.xlu0 %2721  ;;  %v2744_v14 = vrot.slane %v2719_v3, %v4238_v44 }
 0x5d4   :  { %v2748_v15 = vrot.slane %v2722_v12, %v4238_v44 }
 0x5d6   :  { %v2725_v5 = vpop.permute.xlu1 %2724  ;;  %v2773_v46 = vsel %vm2626_vm4, %v2748_v15, %v2744_v14 }
 0x5d7   :  { %v2752_v19 = vrot.slane %v2725_v5, %v4238_v44 }
 0x5d9   :  { %v2774_v48 = vsel %vm2628_vm5, %v2752_v19, %v2773_v46 }
 0x5da   :  { %v2728_v40 = vpop.permute.xlu1 %2727 }
 0x5db   :  { %v2756_v21 = vrot.slane %v2728_v40, %v4238_v44  ;;  %v2963_v40 = vpop.permute.xlu0 %2962 }
 0x5dc   :  { %v2989_v14 = vrot.slane %v2963_v40, %v4238_v44 }
 0x5dd   :  { %v2775_v32 = vsel %vm2630_vm6, %v2756_v21, %v2774_v48 }
 0x5de   :  { %v2731_v6 = vpop.permute.xlu1 %2730 }
 0x5df   :  { %v2760_v42 = vrot.slane %v2731_v6, %v4238_v44  ;;  %v2972_v15 = vpop.permute.xlu0 %2971 }
 0x5e0   :  { %v3001_v48 = vrot.slane %v2972_v15, %v4238_v44 }
 0x5e1   :  { %v2776_v51 = vsel %vm2632_vm7, %v2760_v42, %v2775_v32 }
 0x5e2   :  { %v2734_v13 = vpop.permute.xlu1 %2733 }
 0x5e3   :  { %v2764_v47 = vrot.slane %v2734_v13, %v4238_v44  ;;  %v2978_v32 = vpop.permute.xlu0 %2977 }
 0x5e5   :  { %v2777_v53 = vsel %vm2634_vm8, %v2764_v47, %v2776_v51 }
 0x5e6   :  { %v2737_v28 = vpop.permute.xlu1 %2736 }
 0x5e7   :  { %v2768_v49 = vrot.slane %v2737_v28, %v4238_v44 }
 0x5e9   :  { %v2778_v54 = vsel %vm2636_vm9, %v2768_v49, %v2777_v53 }
 0x5ea   :  { %v2740_v52 = vpop.permute.xlu1 %2739 }
 0x5eb   :  { %v2772_v25 = vrot.slane %v2740_v52, %v4238_v44 }
 0x5ed   :  { %v2779_v55 = vsel %vm2638_vm10, %v2772_v25, %v2778_v54  ;;  %v3009_v25 = vrot.slane %v2978_v32, %v4238_v44 }
 0x5ee   :  { %v2781_v34 = vsel %vm995_vm2, %v2779_v55, 0.0 }
 0x5ef   :  { %2782 = vadd.xlane.f32.xlu1 %v2781_v34 }
 0x600   :  { %2959 = vperm.xlu1 %3627, %v4417_v17  }
 0x604   :  { %2965 = vperm.xlu1 %3627, %v4420_v1  }
 0x608   :  { %2968 = vperm.xlu1 %3627, %v4423_v45  }
 0x60c   :  { %2974 = vperm.xlu1 %3627, %v4426_v30  }
 0x610   :  { %2980 = vperm.xlu1 %3627, %v4429_v39  }
 0x678   :  { %v2783_v3 = vpop.xlane.xlu1 %2782 }
 0x679   :  { %3709 = vrcp.f32 %v2783_v3 }
 0x67c   :  { %v2960_v5 = vpop.permute.xlu1 %2959 }
 0x67d   :  { %v2985_v12 = vrot.slane %v2960_v5, %v4238_v44 }
 0x67f   :  { %v3014_v21 = vsel %vm2626_vm4, %v2989_v14, %v2985_v12 }
 0x680   :  { %v2966_v6 = vpop.permute.xlu1 %2965 }
 0x681   :  { %v2993_v13 = vrot.slane %v2966_v6, %v4238_v44  ;;  %v3714_v6 = vld [vmem:[#allocation2 + $0x8] sm:$0xff] }
 0x683   :  { %v3015_v28 = vsel %vm2628_vm5, %v2993_v13, %v3014_v21 }
 0x684   :  { %v2969_v19 = vpop.permute.xlu1 %2968 }
 0x685   :  { %v2997_v59 = vrot.slane %v2969_v19, %v4238_v44  ;;  %v3715_v19 = vld [vmem:[#allocation2 + $0x10] sm:$0xff] }
 0x686   :  { %v3710_v42 = vpop.eup %3709 }
 0x687   :  { %v3016_v46 = vsel %vm2630_vm6, %v2997_v59, %v3015_v28  ;;  %v2789_v47 = vrot.slane %v3710_v42, %v4303_v7  ;;  %v2793_v51 = vrot.slane %v3710_v42, %v4306_v8  ;;  %v2797_v16 = vrot.slane %v3710_v42, %v4309_v9 }
 0x688   :  { %v2975_v49 = vpop.permute.xlu1 %2974  ;;  %v3017_v52 = vsel %vm2632_vm7, %v3001_v48, %v3016_v46  ;;  %v2801_v24 = vrot.slane %v3710_v42, %v4312_v11  ;;  %v2809_v22 = vrot.slane %v3710_v42, %v4327_v29  ;;  %v2813_v26 = vrot.slane %v3710_v42, %v4336_v23  ;;  %v3716_v48 = vld [vmem:[#allocation2 + $0x18] sm:$0xff] }
 0x689   :  { %v3005_v31 = vrot.slane %v2975_v49, %v4238_v44  ;;  %v2826_v50 = vmul.f32 %v4352_v35, %v2789_v47  ;;  %v2827_v57 = vmul.f32 %v4354_v20, %v2793_v51  ;;  %v2828_v4 = vmul.f32 %v4359_v38, %v2797_v16 }
 0x68a   :  { %v2829_v36 = vmul.f32 %v4362_v10, %v2801_v24  ;;  %v2831_v27 = vmul.f32 %v4374_v62, %v2809_v22  ;;  %v2832_v38 = vmul.f32 %v4380_v0, %v2813_v26  ;;  %v2817_v43 = vrot.slane %v3710_v42, %v4345_v56  ;;  %v3718_v26 = vld [vmem:[#allocation2 + $0x28] sm:$0xff] }
 0x68b   :  { %v3018_v53 = vsel %vm2634_vm8, %v3005_v31, %v3017_v52  ;;  %3077 = vperm.xlu1 %3627, %v2826_v50  }
 0x68c   :  { %v2981_v54 = vpop.permute.xlu1 %2980  ;;  %v3019_v41 = vsel %vm2636_vm9, %v3009_v25, %v3018_v53  ;;  %v2833_v10 = vmul.f32 %v4383_v2, %v2817_v43 }
 0x68d   :  { %v3013_v55 = vrot.slane %v2981_v54, %v4238_v44  ;;  %v2805_v44 = vrot.slane %v3710_v42, %v4318_v18 }
 0x68f   :  { %3082 = vperm.xlu1 %3627, %v2827_v57   ;;  %v3020_v35 = vsel %vm2638_vm10, %v3013_v55, %v3019_v41  ;;  %v2830_v20 = vmul.f32 %v4368_v61, %v2805_v44  ;;  %v3717_v55 = vld [vmem:[#allocation2 + $0x20] sm:$0xff] }
 0x690   :  { %v3022_v34 = vsel %vm995_vm2, %v3020_v35, 0.0 }
 0x691   :  { %3023 = vadd.xlane.f32.xlu0 %v3022_v34 }
 0x693   :  { %3087 = vperm.xlu1 %3627, %v2828_v4  }
 0x697   :  { %3092 = vperm.xlu1 %3627, %v2829_v36  }
 0x69b   :  { %3097 = vperm.xlu1 %3627, %v2830_v20  }
 0x69f   :  { %3102 = vperm.xlu1 %3627, %v2831_v27  }
 0x6a3   :  { %3107 = vperm.xlu1 %3627, %v2832_v38  }
 0x6a7   :  { %3112 = vperm.xlu1 %3627, %v2833_v10  }
 0x706   :  { %v3078_v37 = vpop.permute.xlu1 %3077 }
 0x707   :  { %v3115_v3 = vmul.f32 %v3713_v33, %v3078_v37 }
 0x709   :  { %v3123_v61 = vsel %vm103_vm0, %v3115_v3, 0.0 }
 0x70a   :  { %v3124_v5 = vrot.slane %v3123_v61, 4  ;;  %v3083_v40 = vpop.permute.xlu1 %3082 }
 0x70b   :  { %v3116_v62 = vmul.f32 %v3714_v6, %v3083_v40 }
 0x70c   :  { %v3125_v12 = vadd.f32 %v3124_v5, %v3123_v61 }
 0x70d   :  { %v3130_v13 = vsel %vm103_vm0, %v3116_v62, 0.0  ;;  %v3719_v62 = vld [vmem:[#allocation2 + $0x30] sm:$0xff] }
 0x70e   :  { %v3126_v14 = vrot.slane %v3125_v12, 2  ;;  %v3131_v0 = vrot.slane %v3130_v13, 4  ;;  %v3088_v15 = vpop.permute.xlu1 %3087 }
 0x70f   :  { %v3117_v21 = vmul.f32 %v3715_v19, %v3088_v15 }
 0x710   :  { %v3127_v59 = vadd.f32 %v3126_v14, %v3125_v12  ;;  %v3132_v2 = vadd.f32 %v3131_v0, %v3130_v13 }
 0x711   :  { %v3137_v42 = vsel %vm103_vm0, %v3117_v21, 0.0 }
 0x712   :  { %v3133_v28 = vrot.slane %v3132_v2, 2  ;;  %v3138_v46 = vrot.slane %v3137_v42, 4  ;;  %v3093_v47 = vpop.permute.xlu1 %3092  ;;  %v3128_v32 = vrot.slane %v3127_v59, 1 }
 0x713   :  { %v3118_v49 = vmul.f32 %v3716_v48, %v3093_v47 }
 0x714   :  { %v3134_v31 = vadd.f32 %v3133_v28, %v3132_v2  ;;  %v3139_v50 = vadd.f32 %v3138_v46, %v3137_v42  ;;  %v3129_v16 = vadd.f32 %v3128_v32, %v3127_v59 }
 0x715   :  { %v3144_v51 = vsel %vm103_vm0, %v3118_v49, 0.0 }
 0x716   :  { %v3135_v52 = vrot.slane %v3134_v31, 1  ;;  %v3140_v53 = vrot.slane %v3139_v50, 2  ;;  %v3145_v25 = vrot.slane %v3144_v51, 4  ;;  %v3098_v54 = vpop.permute.xlu1 %3097 }
 0x717   :  { %v3119_v57 = vmul.f32 %v3717_v55, %v3098_v54 }
 0x718   :  { %v3136_v41 = vadd.f32 %v3135_v52, %v3134_v31  ;;  %v3141_v35 = vadd.f32 %v3140_v53, %v3139_v50  ;;  %v3146_v34 = vadd.f32 %v3145_v25, %v3144_v51 }
 0x719   :  { %v3151_v4 = vsel %vm103_vm0, %v3119_v57, 0.0 }
 0x71a   :  { %v3291_v24 = vsel %vm2626_vm4, %v3136_v41, %v3129_v16  ;;  %v3142_v36 = vrot.slane %v3141_v35, 1  ;;  %v3147_v44 = vrot.slane %v3146_v34, 2  ;;  %v3152_v20 = vrot.slane %v3151_v4, 4  ;;  %v3103_v22 = vpop.permute.xlu1 %3102  ;;  %v3024_v27 = vpop.xlane.xlu0 %3023 }
 0x71b   :  { %v3120_v38 = vmul.f32 %v3718_v26, %v3103_v22  ;;  %3711 = vrcp.f32 %v3024_v27  ;;  %v3722_v26 = vld [vmem:[#allocation5 + $0x10] sm:$0xff] }
 0x71c   :  { %v3143_v43 = vadd.f32 %v3142_v36, %v3141_v35  ;;  %v3148_v10 = vadd.f32 %v3147_v44, %v3146_v34  ;;  %v3153_v37 = vadd.f32 %v3152_v20, %v3151_v4  ;;  %v3720_v36 = vld [vmem:[#allocation5 + $0x8] sm:$0xff]  ;;  %v3721_v44 = vld [vmem:[#allocation5] sm:$0xff] }
 0x71d   :  { %v3158_v33 = vsel %vm103_vm0, %v3120_v38, 0.0 }
 0x71e   :  { %v3292_v3 = vsel %vm2628_vm5, %v3143_v43, %v3291_v24  ;;  %v3149_v61 = vrot.slane %v3148_v10, 1  ;;  %v3154_v5 = vrot.slane %v3153_v37, 2  ;;  %v3159_v40 = vrot.slane %v3158_v33, 4  ;;  %v3108_v6 = vpop.permute.xlu1 %3107 }
 0x71f   :  { %v3121_v12 = vmul.f32 %v3719_v62, %v3108_v6 }
 0x720   :  { %v3150_v13 = vadd.f32 %v3149_v61, %v3148_v10  ;;  %v3155_v14 = vadd.f32 %v3154_v5, %v3153_v37  ;;  %v3160_v0 = vadd.f32 %v3159_v40, %v3158_v33  ;;  %v3724_v5 = vld [vmem:[#allocation5 + $0x18] sm:$0xff] }
 0x721   :  { %v3165_v15 = vsel %vm103_vm0, %v3121_v12, 0.0 }
 0x722   :  { %v3293_v19 = vsel %vm2630_vm6, %v3150_v13, %v3292_v3  ;;  %v3156_v21 = vrot.slane %v3155_v14, 1  ;;  %v3161_v59 = vrot.slane %v3160_v0, 2  ;;  %v3166_v2 = vrot.slane %v3165_v15, 4 }
 0x724   :  { %v3157_v42 = vadd.f32 %v3156_v21, %v3155_v14  ;;  %v3162_v28 = vadd.f32 %v3161_v59, %v3160_v0  ;;  %v3167_v46 = vadd.f32 %v3166_v2, %v3165_v15  ;;  %v3725_v59 = vld [vmem:[#allocation5 + $0x20] sm:$0xff] }
 0x726   :  { %v3163_v47 = vrot.slane %v3162_v28, 1  ;;  %v3168_v48 = vrot.slane %v3167_v46, 2  ;;  %v3294_v49 = vsel %vm2632_vm7, %v3157_v42, %v3293_v19 }
 0x728   :  { %v3712_v32 = vpop.eup %3711  ;;  %v3169_v31 = vadd.f32 %v3168_v48, %v3167_v46  ;;  %v3164_v50 = vadd.f32 %v3163_v47, %v3162_v28 }
 0x729   :  { %v3034_v51 = vrot.slane %v3712_v32, %v4306_v8  ;;  %v3030_v52 = vrot.slane %v3712_v32, %v4303_v7  ;;  %v3038_v55 = vrot.slane %v3712_v32, %v4309_v9  ;;  %v3054_v57 = vrot.slane %v3712_v32, %v4336_v23 }
 0x72a   :  { %v3170_v53 = vrot.slane %v3169_v31, 1  ;;  %v3295_v41 = vsel %vm2634_vm8, %v3164_v50, %v3294_v49  ;;  %v3046_v23 = vrot.slane %v3712_v32, %v4318_v18  ;;  %v3050_v34 = vrot.slane %v3712_v32, %v4327_v29 }
 0x72b   :  { %v3068_v25 = vmul.f32 %v4364_v60, %v3034_v51  ;;  %v3067_v54 = vmul.f32 %v4417_v17, %v3030_v52  ;;  %v3069_v8 = vmul.f32 %v4420_v1, %v3038_v55  ;;  %v3073_v7 = vmul.f32 %v4376_v63, %v3054_v57  ;;  %v3726_v51 = vld [vmem:[#allocation5 + $0x28] sm:$0xff] }
 0x72c   :  { %v3171_v16 = vadd.f32 %v3170_v53, %v3169_v31  ;;  %v3042_v60 = vrot.slane %v3712_v32, %v4312_v11  ;;  %v3071_v17 = vmul.f32 %v4370_v58, %v3046_v23  ;;  %v3072_v4 = vmul.f32 %v4426_v30, %v3050_v34  ;;  %v4495_v11 = vpop.permute.xlu1 %3112 }
 0x72d   :  { %3186 = vperm.xlu1 %3627, %v3068_v25   ;;  %3181 = vperm.xlu0 %3628, %v3067_v54   ;;  %v3058_v1 = vrot.slane %v3712_v32, %v4345_v56 }
 0x72e   :  { %v4483_v35 = vsel %vm2636_vm9, %v3171_v16, %v3295_v41  ;;  %v3070_v9 = vmul.f32 %v4423_v45, %v3042_v60 }
 0x72f   :  { %v3074_v63 = vmul.f32 %v4429_v39, %v3058_v1  ;;  %v3723_v39 = vld [vmem:[#allocation5 + $0x30] sm:$0xff] }
 0x731   :  { %3191 = vperm.xlu1 %3627, %v3069_v8   ;;  %3211 = vperm.xlu0 %3628, %v3073_v7  }
 0x735   :  { %3196 = vperm.xlu1 %3627, %v3070_v9   ;;  %v3727_v9 = vld [vmem:[#allocation5 + $0x38] sm:$0xff] }
 0x739   :  { %3201 = vperm.xlu1 %3627, %v3071_v17  }
 0x73d   :  { %3206 = vperm.xlu1 %3627, %v3072_v4  }
 0x741   :  { %3216 = vperm.xlu1 %3627, %v3074_v63  }
 0x7a8   :  { %v3187_v24 = vpop.permute.xlu1 %3186  ;;  %v3182_v45 = vpop.permute.xlu0 %3181 }
 0x7a9   :  { %v3220_v18 = vmul.f32 %v3720_v36, %v3187_v24  ;;  %v3219_v20 = vmul.f32 %v3721_v44, %v3182_v45 }
 0x7ab   :  { %v3234_v58 = vsel %vm103_vm0, %v3220_v18, 0.0  ;;  %v3227_v29 = vsel %vm103_vm0, %v3219_v20, 0.0 }
 0x7ac   :  { %v3235_v22 = vrot.slane %v3234_v58, 4  ;;  %v3228_v30 = vrot.slane %v3227_v29, 4  ;;  %v3192_v27 = vpop.permute.xlu1 %3191  ;;  %v3212_v56 = vpop.permute.xlu0 %3211 }
 0x7ad   :  { %v3221_v38 = vmul.f32 %v3722_v26, %v3192_v27  ;;  %v3225_v43 = vmul.f32 %v3723_v39, %v3212_v56 }
 0x7ae   :  { %v3236_v10 = vadd.f32 %v3235_v22, %v3234_v58  ;;  %v3229_v33 = vadd.f32 %v3228_v30, %v3227_v29 }
 0x7af   :  { %v3241_v37 = vsel %vm103_vm0, %v3221_v38, 0.0  ;;  %v3269_v62 = vsel %vm103_vm0, %v3225_v43, 0.0 }
 0x7b0   :  { %v3242_v3 = vrot.slane %v3241_v37, 4  ;;  %v3197_v61 = vpop.permute.xlu1 %3196  ;;  %v3237_v12 = vrot.slane %v3236_v10, 2  ;;  %v3230_v14 = vrot.slane %v3229_v33, 2  ;;  %v3270_v19 = vrot.slane %v3269_v62, 4 }
 0x7b1   :  { %v3222_v40 = vmul.f32 %v3724_v5, %v3197_v61 }
 0x7b2   :  { %v3243_v6 = vadd.f32 %v3242_v3, %v3241_v37  ;;  %v3238_v42 = vadd.f32 %v3237_v12, %v3236_v10  ;;  %v3231_v47 = vadd.f32 %v3230_v14, %v3229_v33  ;;  %v3271_v31 = vadd.f32 %v3270_v19, %v3269_v62  ;;  %v3728_v12 = vld [vmem:[#allocation2 + $0x38] sm:$0xff] }
 0x7b3   :  { %v3248_v13 = vsel %vm103_vm0, %v3222_v40, 0.0 }
 0x7b4   :  { %v3202_v0 = vpop.permute.xlu1 %3201  ;;  %v3244_v15 = vrot.slane %v3243_v6, 2  ;;  %v3249_v21 = vrot.slane %v3248_v13, 4  ;;  %v3239_v25 = vrot.slane %v3238_v42, 1  ;;  %v3232_v57 = vrot.slane %v3231_v47, 1 }
 0x7b5   :  { %v3223_v2 = vmul.f32 %v3725_v59, %v3202_v0  ;;  %v3272_v60 = vrot.slane %v3271_v31, 2 }
 0x7b6   :  { %v3250_v28 = vadd.f32 %v3249_v21, %v3248_v13  ;;  %v3245_v32 = vadd.f32 %v3244_v15, %v3243_v6  ;;  %v3240_v1 = vadd.f32 %v3239_v25, %v3238_v42  ;;  %v3233_v24 = vadd.f32 %v3232_v57, %v3231_v47 }
 0x7b7   :  { %v3255_v46 = vsel %vm103_vm0, %v3223_v2, 0.0  ;;  %v3273_v20 = vadd.f32 %v3272_v60, %v3271_v31  ;;  %v3122_v13 = vmul.f32 %v3728_v12, %v4495_v11 }
 0x7b8   :  { %v3256_v48 = vrot.slane %v3255_v46, 4  ;;  %v3207_v49 = vpop.permute.xlu1 %3206  ;;  %v3251_v50 = vrot.slane %v3250_v28, 2  ;;  %v3246_v7 = vrot.slane %v3245_v32, 1  ;;  %v3307_v27 = vsel %vm2626_vm4, %v3240_v1, %v3233_v24 }
 0x7b9   :  { %v3224_v52 = vmul.f32 %v3726_v51, %v3207_v49  ;;  %v3274_v39 = vrot.slane %v3273_v20, 1  ;;  %v3172_v14 = vsel %vm103_vm0, %v3122_v13, 0.0 }
 0x7ba   :  { %v3257_v53 = vadd.f32 %v3256_v48, %v3255_v46  ;;  %v3252_v54 = vadd.f32 %v3251_v50, %v3250_v28  ;;  %v3247_v44 = vadd.f32 %v3246_v7, %v3245_v32  ;;  %v3173_v0 = vrot.slane %v3172_v14, 4 }
 0x7bb   :  { %v3262_v55 = vsel %vm103_vm0, %v3224_v52, 0.0  ;;  %v3275_v5 = vadd.f32 %v3274_v39, %v3273_v20 }
 0x7bc   :  { %v3258_v16 = vrot.slane %v3257_v53, 2  ;;  %v3263_v41 = vrot.slane %v3262_v55, 4  ;;  %v3217_v8 = vpop.permute.xlu1 %3216  ;;  %v3253_v17 = vrot.slane %v3252_v54, 1  ;;  %v3308_v38 = vsel %vm2628_vm5, %v3247_v44, %v3307_v27 }
 0x7bd   :  { %v3226_v23 = vmul.f32 %v3727_v9, %v3217_v8  ;;  %v3174_v15 = vadd.f32 %v3173_v0, %v3172_v14 }
 0x7be   :  { %v3259_v34 = vadd.f32 %v3258_v16, %v3257_v53  ;;  %v3264_v4 = vadd.f32 %v3263_v41, %v3262_v55  ;;  %v3254_v58 = vadd.f32 %v3253_v17, %v3252_v54 }
 0x7bf   :  { %v3276_v63 = vsel %vm103_vm0, %v3226_v23, 0.0  ;;  %v3175_v19 = vrot.slane %v3174_v15, 2 }
 0x7c0   :  { %v3260_v45 = vrot.slane %v3259_v34, 1  ;;  %v3265_v36 = vrot.slane %v3264_v4, 2  ;;  %v3277_v18 = vrot.slane %v3276_v63, 4  ;;  %v3309_v37 = vsel %vm2630_vm6, %v3254_v58, %v3308_v38 }
 0x7c1   :  { %v3176_v21 = vadd.f32 %v3175_v19, %v3174_v15 }
 0x7c2   :  { %v3266_v29 = vadd.f32 %v3265_v36, %v3264_v4  ;;  %v3278_v22 = vadd.f32 %v3277_v18, %v3276_v63  ;;  %v3261_v30 = vadd.f32 %v3260_v45, %v3259_v34 }
 0x7c3   :  { %v3177_v59 = vrot.slane %v3176_v21, 1 }
 0x7c4   :  { %v3267_v56 = vrot.slane %v3266_v29, 1  ;;  %v3279_v26 = vrot.slane %v3278_v22, 2  ;;  %v3310_v33 = vsel %vm2632_vm7, %v3261_v30, %v3309_v37 }
 0x7c5   :  { %v3178_v2 = vadd.f32 %v3177_v59, %v3176_v21 }
 0x7c6   :  { %v3268_v43 = vadd.f32 %v3267_v56, %v3266_v29  ;;  %v3280_v10 = vadd.f32 %v3279_v26, %v3278_v22 }
 0x7c7   :  { %v3297_v42 = vsel %vm2638_vm10, %v3178_v2, %v4483_v35 }
 0x7c8   :  { %v3281_v3 = vrot.slane %v3280_v10, 1  ;;  %v3311_v61 = vsel %vm2634_vm8, %v3268_v43, %v3310_v33 }
 0x7c9   :  { %v3312_v6 = vsel %vm2636_vm9, %v3275_v5, %v3311_v61 }
 0x7ca   :  { %v3282_v40 = vadd.f32 %v3281_v3, %v3280_v10 }
 0x7cc   :  { %v3313_v62 = vsel %vm2638_vm10, %v3282_v40, %v3312_v6 }
 0x7cd   :  { %3314 = vrot.lane.b32.xlu0 %v3313_v62, %s3846_s3 }
 0x83f   :  { %v3315_v28 = vpop.permute.xlu0 %3314 }
 0x840   :  { %v3317_v46 = vsel %vm103_vm0, %v3297_v42, %v3315_v28 }
 0x841   :  { %3319 = vst.msk [vmem:[#allocation10] sm:$0xff] %vm3318_vm11, %v3317_v46 }
 0x842   :  { %3820 = shalt.err (!%p3817_p10)
}
 0x843   :  { %3329 = dma.vmem_to_hbm [thread:$0]  %s3327_s20, 128, %s4527_s6, [#allocation4]  }
 0x844   :  { %3835 = dma.done.wait [#allocation4], 128  }
 0x845   :  { %3836 = vsyncadd [#allocation4], 4294967168 }
 0x846   :  { %3333 = vsyncpa [#allocation3], 1 }
 0x847   :  { %3334 = vsyncpa [#allocation6], 1 }
 0x848   :  { %3335 = vsyncpa [#allocation9], 1 }
 0x849   :  { %3336 = vsyncpa [#allocation4], 1 }

</bundles_post_ra>
